<compile_context>
chip_gen: v7x
topology: tpu7x:2x2x1
jax: 0.10.0
libtpu: 0.0.40
codegen_flags: <defaults>
</compile_context>

<pallas_src>
import functools

import numpy as np
import jax
import jax.numpy as jnp
from jax.experimental import pallas as pl
from jax.experimental.pallas import tpu as pltpu


LANE = 128


def _round_up(x, m):
    return ((x + m - 1) // m) * m


def _pad2d(x, rows, cols):
    r, c = x.shape
    return jnp.pad(x, ((0, rows - r), (0, cols - c)))


def _pick_tile(pref, *dims):
    """Largest 128-multiple <= pref that divides every nonzero dim."""
    for cand in (1024, 512, 256, 128):
        if cand <= pref and all(d % cand == 0 for d in dims if d):
            return cand
    return 128


@functools.lru_cache(maxsize=None)
def _vmem_budget_bytes():
    # ~75% of per-core VMEM, capped at 100 MiB:
    #   v5e/v6e (128 MiB) -> 96 MiB ; v7x (64 MiB per TensorCore) -> 48 MiB.
    try:
        cap = int(pltpu.get_tpu_info().vmem_capacity_bytes)
    except Exception:  # conservative fallback that fits every current chip
        cap = 64 * 1024 * 1024
    return int(min(100 * 1024 * 1024, cap * 3 // 4))


# -------------------- dense matmul for the hoisted X@W (per layer) --------------------

def _dense_matmul_kernel(x_ref, w_ref, o_ref):
    o_ref[...] = jnp.dot(x_ref[...], w_ref[...],
                         preferred_element_type=jnp.float32).astype(o_ref.dtype)


def dense_matmul(x, w, out_dtype, *, row_tile=256):
    # Feature dims (G/H/E) are small, so the contraction stays un-tiled.
    # TODO(synk): K-tile the contraction if feature dims grow beyond ~1-2k.
    m, kdim = x.shape
    n = w.shape[1]
    row_tile = _pick_tile(row_tile, m)
    return pl.pallas_call(
        _dense_matmul_kernel,
        grid=(m // row_tile,),
        in_specs=[pl.BlockSpec((row_tile, kdim), lambda i: (i, 0)),
                  pl.BlockSpec((kdim, n), lambda i: (0, 0))],      # resident weight
        out_specs=pl.BlockSpec((row_tile, n), lambda i: (i, 0)),
        out_shape=jax.ShapeDtypeStruct((m, n), out_dtype),
        compiler_params=pltpu.CompilerParams(
            dimension_semantics=("parallel",),
            vmem_limit_bytes=_vmem_budget_bytes()),
    )(x, w)


# -------------------- row+K tiled adj @ XW with f32 accumulator --------------------

def _spmm_kernel(adj_ref, xw_ref, o_ref, acc_ref, *, relu):
    k = pl.program_id(1)

    @pl.when(k == 0)
    def _():
        acc_ref[...] = jnp.zeros_like(acc_ref)

    acc_ref[...] += jnp.dot(adj_ref[...], xw_ref[...],
                            preferred_element_type=jnp.float32)

    @pl.when(k == pl.num_programs(1) - 1)
    def _():
        y = acc_ref[...]
        if relu:
            y = jnp.maximum(y, 0.0)
        o_ref[...] = y.astype(o_ref.dtype)


def spmm(adj, xw, *, relu, out_dtype, row_start=0, n_rows=None,
         row_tile=256, k_tile=512):
    # adj: [N_pad, N_pad] bf16 ; xw: [N_pad, gout] bf16.
    # VMEM use is O(row_tile*k_tile + k_tile*gout + row_tile*gout) — independent of
    # N_pad — so larger row tiles are possible on v5e/v6e and the layout fits v7x.
    n_pad = adj.shape[1]
    if n_rows is None:
        n_rows = adj.shape[0] - row_start
    gout = xw.shape[1]
    row_tile = _pick_tile(row_tile, n_rows, row_start)
    k_tile = _pick_tile(k_tile, n_pad)
    row_off = row_start // row_tile                      # block-index offset (rows)
    return pl.pallas_call(
        functools.partial(_spmm_kernel, relu=relu),
        grid=(n_rows // row_tile, n_pad // k_tile),
        in_specs=[
            pl.BlockSpec((row_tile, k_tile), lambda i, k: (i + row_off, k)),
            pl.BlockSpec((k_tile, gout), lambda i, k: (k, 0)),
        ],
        out_specs=pl.BlockSpec((row_tile, gout), lambda i, k: (i, 0)),
        out_shape=jax.ShapeDtypeStruct((n_rows, gout), out_dtype),
        scratch_shapes=[pltpu.VMEM((row_tile, gout), jnp.float32)],
        compiler_params=pltpu.CompilerParams(
            dimension_semantics=("parallel", "arbitrary"),
            vmem_limit_bytes=_vmem_budget_bytes()),
    )(adj, xw)


# ------------- fused image-MLP + logits (no transpose) + cross-entropy -------------

def _embed_score_ce_kernel(img_ref, w1_ref, b1_ref, w2_ref, b2_ref,
                           pair_ref, lbl_ref, logits_ref, loss_ref,
                           *, num_pairs):
    # two-layer image MLP; h / feats never leave VMEM / vregs.
    h = jnp.dot(img_ref[...], w1_ref[...], preferred_element_type=jnp.float32)
    h = jnp.maximum(h + b1_ref[...], 0.0)
    feats = jnp.dot(h, w2_ref[...], preferred_element_type=jnp.float32)
    feats = jnp.maximum(feats + b2_ref[...], 0.0)

    # logits = img_feats @ pair_embed^T without an XLU transpose: contract the E
    # dimension of both operands directly on the MXU.
    logits = jax.lax.dot_general(
        feats, pair_ref[...],
        dimension_numbers=(((1,), (1,)), ((), ())),
        preferred_element_type=jnp.float32)                       # [B, P_pad]

    # mask padded pair columns so softmax / CE are exact.
    col = jax.lax.broadcasted_iota(jnp.int32, logits.shape, 1)
    logits = jnp.where(col < num_pairs, logits, jnp.float32(-1e30))
    logits_ref[...] = logits

    # F.cross_entropy (mean reduction), max-stabilized log-sum-exp.
    m = jnp.max(logits, axis=-1, keepdims=True)
    lse = jnp.log(jnp.sum(jnp.exp(logits - m), axis=-1, keepdims=True)) + m
    correct = jnp.sum(jnp.where(col == lbl_ref[...], logits, 0.0),
                      axis=-1, keepdims=True)
    loss_ref[0, 0] = jnp.mean(lse - correct)


def embed_score_ce(img, w1, b1, w2, b2, pair_cur, labels, *, num_pairs):
    B = img.shape[0]
    p_pad = pair_cur.shape[0]
    lbl = labels.reshape(B, 1).astype(jnp.int32)

    def full(shape):
        return pl.BlockSpec(shape, lambda i: (0,) * len(shape))

    logits, loss = pl.pallas_call(
        functools.partial(_embed_score_ce_kernel, num_pairs=num_pairs),
        grid=(1,),
        in_specs=[full(img.shape), full(w1.shape), full(b1.shape),
                  full(w2.shape), full(b2.shape), full(pair_cur.shape),
                  full(lbl.shape)],
        out_specs=(full((B, p_pad)),
                   pl.BlockSpec(memory_space=pltpu.MemorySpace.SMEM)),
        out_shape=(jax.ShapeDtypeStruct((B, p_pad), jnp.float32),
                   jax.ShapeDtypeStruct((1, 1), jnp.float32)),
        compiler_params=pltpu.CompilerParams(
            dimension_semantics=("arbitrary",),
            vmem_limit_bytes=_vmem_budget_bytes()),
    )(img, w1, b1, w2, b2, pair_cur, lbl)
    return logits, loss


# --------------------------------- GraphFull forward ---------------------------------

def graphfull_train_forward(img, pairs, params, embeddings16, adj16,
                            *, pair_row_start, num_pairs):
    p_pad = _round_up(num_pairs, LANE)

    # GCN layer 1 over all graph nodes: XW hoisted once, then row+K tiled adj spmm.
    xw1 = dense_matmul(embeddings16, params["Wg1"], jnp.bfloat16)
    g1 = spmm(adj16, xw1, relu=True, out_dtype=jnp.bfloat16)

    # GCN layer 2: only the pair-row stripe is consumed downstream.
    # NOTE: valid because nothing else reads the non-pair rows in this forward.
    xw2 = dense_matmul(g1, params["Wg2"], jnp.bfloat16)
    pair_cur = spmm(adj16, xw2, relu=False, out_dtype=jnp.float32,
                    row_start=pair_row_start, n_rows=p_pad)

    # image MLP + logits + cross-entropy, fused; only the pair block is DMA'd.
    logits, loss = embed_score_ce(img, params["W1"], params["b1"],
                                  params["W2"], params["b2"],
                                  pair_cur, pairs, num_pairs=num_pairs)
    pair_pred = logits[:, :num_pairs]
    return loss[0, 0], pair_pred


# ------------------------------------------ main ------------------------------------------

if __name__ == "__main__":
    key = jax.random.PRNGKey(0)

    # logical (unpadded) sizes — deliberately not 128-aligned to exercise padding
    B = 8
    feat_dim, hid, emb_dim, gdim = 48, 96, 80, 64
    num_attrs, num_objs, num_pairs = 8, 8, 24
    AO = num_attrs + num_objs
    N = AO + num_pairs

    # padded, lane-dense sizes (weights padded once at init; padded entries are zero)
    F = _round_up(feat_dim, LANE)
    H = _round_up(hid, LANE)
    E = _round_up(emb_dim, LANE)
    G = _round_up(gdim, LANE)
    P_pad = _round_up(num_pairs, LANE)
    AO_pad = _round_up(AO, LANE)          # pair block starts at a 128-aligned row
    N_pad = AO_pad + P_pad

    keys = jax.random.split(key, 8)
    img = _pad2d(jax.random.normal(keys[0], (B, feat_dim), jnp.float32), B, F)
    pairs = jax.random.randint(keys[1], (B,), 0, num_pairs, dtype=jnp.int32)

    params = {
        # image-MLP params (f32)
        "W1": _pad2d(0.1 * jax.random.normal(keys[2], (feat_dim, hid), jnp.float32), F, H),
        "b1": jnp.zeros((1, H), jnp.float32),
        "W2": _pad2d(0.1 * jax.random.normal(keys[3], (hid, emb_dim), jnp.float32), H, E),
        "b2": jnp.zeros((1, E), jnp.float32),
        # GCN params (bf16 for the MXU, f32 accumulation inside the kernels)
        "Wg1": _pad2d(0.1 * jax.random.normal(keys[4], (gdim, hid), jnp.float32), G, H
                      ).astype(jnp.bfloat16),
        "Wg2": _pad2d(0.1 * jax.random.normal(keys[5], (hid, emb_dim), jnp.float32), H, E
                      ).astype(jnp.bfloat16),
    }

    # Graph node embeddings (stand-in for graph['embeddings']).  Node layout:
    # attrs+objs at rows [0, AO), pair nodes at rows [AO_pad, AO_pad + num_pairs);
    # padding rows/cols are zero.
    emb_real = np.asarray(jax.random.normal(keys[6], (N, gdim), jnp.float32))
    emb_np = np.zeros((N_pad, G), np.float32)
    emb_np[:AO, :gdim] = emb_real[:AO]
    emb_np[AO_pad:AO_pad + num_pairs, :gdim] = emb_real[AO:]
    embeddings16 = jnp.asarray(emb_np, dtype=jnp.bfloat16)

    # Symmetric-normalized adjacency (identity + pair<->attr + pair<->obj edges),
    # laid out in the padded node order and cast to bf16 once.
    A = np.zeros((N_pad, N_pad), np.float32)
    for r in list(range(AO)) + list(range(AO_pad, AO_pad + num_pairs)):
        A[r, r] = 1.0
    for p in range(num_pairs):
        a = p % num_attrs
        o = (p // num_attrs) % num_objs
        pi = AO_pad + p
        A[pi, a] = A[a, pi] = 1.0
        A[pi, num_attrs + o] = A[num_attrs + o, pi] = 1.0
    deg = A.sum(1)
    dinv = np.where(deg > 0.0, 1.0 / np.sqrt(np.maximum(deg, 1e-12)), 0.0)
    A = A * dinv[:, None] * dinv[None, :]
    adj16 = jnp.asarray(A, dtype=jnp.bfloat16)

    fwd = jax.jit(functools.partial(
        graphfull_train_forward,
        pair_row_start=AO_pad, num_pairs=num_pairs))

    loss, pair_pred = fwd(img, pairs, params, embeddings16, adj16)
    jax.block_until_ready((loss, pair_pred))

    # ---- pure-JAX reference (same bf16/f32 dtype choices) as a sanity check ----
    def reference():
        xw1 = jnp.dot(embeddings16, params["Wg1"],
                      preferred_element_type=jnp.float32).astype(jnp.bfloat16)
        g1 = jnp.maximum(jnp.dot(adj16, xw1, preferred_element_type=jnp.float32),
                         0.0).astype(jnp.bfloat16)
        xw2 = jnp.dot(g1, params["Wg2"],
                      preferred_element_type=jnp.float32).astype(jnp.bfloat16)
        cur = jnp.dot(adj16[AO_pad:AO_pad + P_pad], xw2,
                      preferred_element_type=jnp.float32)
        h = jnp.maximum(jnp.dot(img, params["W1"]) + params["b1"], 0.0)
        feats = jnp.maximum(jnp.dot(h, params["W2"]) + params["b2"], 0.0)
        logit = jnp.dot(feats, cur.T)[:, :num_pairs]
        lse = jax.nn.logsumexp(logit, axis=-1)
        picked = jnp.take_along_axis(logit, pairs[:, None], axis=1)[:, 0]
        return jnp.mean(lse - picked), logit

    ref_loss, ref_pred = jax.jit(reference)()
    jax.block_until_ready((ref_loss, ref_pred))

    assert pair_pred.shape == (B, num_pairs)
    assert loss.shape == () and bool(jnp.isfinite(loss))
    assert np.allclose(np.asarray(loss), np.asarray(ref_loss), rtol=3e-2, atol=3e-2)
    assert np.allclose(np.asarray(pair_pred), np.asarray(ref_pred), rtol=3e-2, atol=3e-2)
    print("KERNEL_OK")
</pallas_src>

<mosaic_0001>
module attributes {stable_mosaic.version = 11 : i64} {
  func.func @_dense_matmul_kernel(%arg0: i32, %arg1: memref<256x128xbf16, #tpu.memory_space<vmem>>, %arg2: memref<128x128xbf16, #tpu.memory_space<vmem>>, %arg3: memref<256x128xbf16, #tpu.memory_space<vmem>>) attributes {dimension_semantics = [#tpu.dimension_semantics<parallel>], iteration_bounds = array<i64: 1>, scalar_prefetch = 0 : i64, scratch_operands = 0 : i64, tpu.core_type = #tpu.core_type<tc>, window_params = [{transform_indices = @transform_0, window_bounds = array<i64: 256, 128>}, {pipeline_mode = #tpu.pipeline_mode<synchronous>, transform_indices = @transform_1, window_bounds = array<i64: 128, 128>}, {transform_indices = @transform_2, window_bounds = array<i64: 256, 128>}]} {
    %c0 = arith.constant 0 : index
    %c0_0 = arith.constant 0 : index
    %0 = vector.load %arg1[%c0, %c0_0] : memref<256x128xbf16, #tpu.memory_space<vmem>>, vector<256x128xbf16>
    %c0_1 = arith.constant 0 : index
    %c0_2 = arith.constant 0 : index
    %1 = vector.load %arg2[%c0_1, %c0_2] : memref<128x128xbf16, #tpu.memory_space<vmem>>, vector<128x128xbf16>
    %cst = arith.constant dense<0.000000e+00> : vector<256x128xf32>
    %2 = tpu.matmul %0, %1, %cst {dimension_numbers = #tpu.dot_dimension_numbers<[1], [0], [0], [1], [0, 0, 1, 1], [], []>} : vector<256x128xbf16>, vector<128x128xbf16>, vector<256x128xf32> -> vector<256x128xf32>
    %3 = arith.truncf %2 : vector<256x128xf32> to vector<256x128xbf16>
    %c0_3 = arith.constant 0 : index
    %c0_4 = arith.constant 0 : index
    %4 = vector.load %arg3[%c0_3, %c0_4] : memref<256x128xbf16, #tpu.memory_space<vmem>>, vector<256x128xbf16>
    tpu.vector_store %arg3[%c0_3, %c0_4], %3 {strides = array<i32>} : memref<256x128xbf16, #tpu.memory_space<vmem>>, vector<256x128xbf16>,
    return
  }
  func.func @transform_0(%arg0: i32) -> (i32, i32) {
    %c0_i32 = arith.constant 0 : i32
    %c0_i32_0 = arith.constant 0 : i32
    return %arg0, %c0_i32 : i32, i32
  }
  func.func @transform_1(%arg0: i32) -> (i32, i32) {
    %c0_i32 = arith.constant 0 : i32
    %c0_i32_0 = arith.constant 0 : i32
    %c0_i32_1 = arith.constant 0 : i32
    return %c0_i32, %c0_i32_0 : i32, i32
  }
  func.func @transform_2(%arg0: i32) -> (i32, i32) {
    %c0_i32 = arith.constant 0 : i32
    %c0_i32_0 = arith.constant 0 : i32
    return %arg0, %c0_i32 : i32, i32
  }
}

module attributes {stable_mosaic.version = 11 : i64} {
  func.func @_dense_matmul_kernel(%arg0: i32, %arg1: memref<256x128xbf16, #tpu.memory_space<vmem>>, %arg2: memref<128x128xbf16, #tpu.memory_space<vmem>>, %arg3: memref<256x128xbf16, #tpu.memory_space<vmem>>) attributes {dimension_semantics = [#tpu.dimension_semantics<parallel>], iteration_bounds = array<i64: 1>, scalar_prefetch = 0 : i64, scratch_operands = 0 : i64, tpu.core_type = #tpu.core_type<tc>, window_params = [{transform_indices = @transform_0, window_bounds = array<i64: 256, 128>}, {pipeline_mode = #tpu.pipeline_mode<synchronous>, transform_indices = @transform_1, window_bounds = array<i64: 128, 128>}, {transform_indices = @transform_2, window_bounds = array<i64: 256, 128>}]} {
    %c0 = arith.constant 0 : index
    %c0_0 = arith.constant 0 : index
    %0 = vector.load %arg1[%c0, %c0_0] : memref<256x128xbf16, #tpu.memory_space<vmem>>, vector<256x128xbf16>
    %c0_1 = arith.constant 0 : index
    %c0_2 = arith.constant 0 : index
    %1 = vector.load %arg2[%c0_1, %c0_2] : memref<128x128xbf16, #tpu.memory_space<vmem>>, vector<128x128xbf16>
    %cst = arith.constant dense<0.000000e+00> : vector<256x128xf32>
    %2 = tpu.matmul %0, %1, %cst {dimension_numbers = #tpu.dot_dimension_numbers<[1], [0], [0], [1], [0, 0, 1, 1], [], []>} : vector<256x128xbf16>, vector<128x128xbf16>, vector<256x128xf32> -> vector<256x128xf32>
    %3 = arith.truncf %2 : vector<256x128xf32> to vector<256x128xbf16>
    %c0_3 = arith.constant 0 : index
    %c0_4 = arith.constant 0 : index
    %4 = vector.load %arg3[%c0_3, %c0_4] : memref<256x128xbf16, #tpu.memory_space<vmem>>, vector<256x128xbf16>
    tpu.vector_store %arg3[%c0_3, %c0_4], %3 {strides = array<i32>} : memref<256x128xbf16, #tpu.memory_space<vmem>>, vector<256x128xbf16>,
    return
  }
  func.func @transform_0(%arg0: i32) -> (i32, i32) {
    %c0_i32 = arith.constant 0 : i32
    %c0_i32_0 = arith.constant 0 : i32
    return %arg0, %c0_i32 : i32, i32
  }
  func.func @transform_1(%arg0: i32) -> (i32, i32) {
    %c0_i32 = arith.constant 0 : i32
    %c0_i32_0 = arith.constant 0 : i32
    %c0_i32_1 = arith.constant 0 : i32
    return %c0_i32, %c0_i32_0 : i32, i32
  }
  func.func @transform_2(%arg0: i32) -> (i32, i32) {
    %c0_i32 = arith.constant 0 : i32
    %c0_i32_0 = arith.constant 0 : i32
    return %arg0, %c0_i32 : i32, i32
  }
}

module attributes {stable_mosaic.version = 11 : i64} {
  func.func @_spmm_kernel(%arg0: i32, %arg1: i32, %arg2: memref<256x256xbf16, #tpu.memory_space<vmem>>, %arg3: memref<256x128xbf16, #tpu.memory_space<vmem>>, %arg4: memref<256x128xbf16, #tpu.memory_space<vmem>>, %arg5: memref<256x128xf32, #tpu.memory_space<vmem>>) attributes {dimension_semantics = [#tpu.dimension_semantics<parallel>, #tpu.dimension_semantics<arbitrary>], iteration_bounds = array<i64: 1, 1>, scalar_prefetch = 0 : i64, scratch_operands = 1 : i64, tpu.core_type = #tpu.core_type<tc>, window_params = [{transform_indices = @transform_0, window_bounds = array<i64: 256, 256>}, {transform_indices = @transform_1, window_bounds = array<i64: 256, 128>}, {transform_indices = @transform_2, window_bounds = array<i64: 256, 128>}]} {
    %c0_i32 = arith.constant 0 : i32
    %0 = arith.cmpi eq, %arg1, %c0_i32 : i32
    %1 = arith.extui %0 : i1 to i32
    %c0_i32_0 = arith.constant 0 : i32
    %2 = arith.cmpi ne, %1, %c0_i32_0 : i32
    scf.if %2 {
      %cst_10 = arith.constant 0.000000e+00 : f32
      %12 = vector.broadcast %cst_10 : f32 to vector<256x128xf32>
      %c0_11 = arith.constant 0 : index
      %c0_12 = arith.constant 0 : index
      %13 = vector.load %arg5[%c0_11, %c0_12] : memref<256x128xf32, #tpu.memory_space<vmem>>, vector<256x128xf32>
      tpu.vector_store %arg5[%c0_11, %c0_12], %12 {strides = array<i32>} : memref<256x128xf32, #tpu.memory_space<vmem>>, vector<256x128xf32>,
    } else {
    }
    %c0 = arith.constant 0 : index
    %c0_1 = arith.constant 0 : index
    %3 = vector.load %arg5[%c0, %c0_1] : memref<256x128xf32, #tpu.memory_space<vmem>>, vector<256x128xf32>
    %c0_2 = arith.constant 0 : index
    %c0_3 = arith.constant 0 : index
    %4 = vector.load %arg2[%c0_2, %c0_3] : memref<256x256xbf16, #tpu.memory_space<vmem>>, vector<256x256xbf16>
    %c0_4 = arith.constant 0 : index
    %c0_5 = arith.constant 0 : index
    %5 = vector.load %arg3[%c0_4, %c0_5] : memref<256x128xbf16, #tpu.memory_space<vmem>>, vector<256x128xbf16>
    %cst = arith.constant dense<0.000000e+00> : vector<256x128xf32>
    %6 = tpu.matmul %4, %5, %cst {dimension_numbers = #tpu.dot_dimension_numbers<[1], [0], [0], [1], [0, 0, 1, 1], [], []>} : vector<256x256xbf16>, vector<256x128xbf16>, vector<256x128xf32> -> vector<256x128xf32>
    %7 = arith.addf %3, %6 : vector<256x128xf32>
    %c0_6 = arith.constant 0 : index
    %c0_7 = arith.constant 0 : index
    %8 = vector.load %arg5[%c0_6, %c0_7] : memref<256x128xf32, #tpu.memory_space<vmem>>, vector<256x128xf32>
    tpu.vector_store %arg5[%c0_6, %c0_7], %7 {strides = array<i32>} : memref<256x128xf32, #tpu.memory_space<vmem>>, vector<256x128xf32>,
    %c0_i32_8 = arith.constant 0 : i32
    %9 = arith.cmpi eq, %arg1, %c0_i32_8 : i32
    %10 = arith.extui %9 : i1 to i32
    %c0_i32_9 = arith.constant 0 : i32
    %11 = arith.cmpi ne, %10, %c0_i32_9 : i32
    scf.if %11 {
      %c0_10 = arith.constant 0 : index
      %c0_11 = arith.constant 0 : index
      %12 = vector.load %arg5[%c0_10, %c0_11] : memref<256x128xf32, #tpu.memory_space<vmem>>, vector<256x128xf32>
      %cst_12 = arith.constant 0.000000e+00 : f32
      %13 = vector.broadcast %cst_12 : f32 to vector<256x128xf32>
      %14 = arith.maximumf %12, %13 : vector<256x128xf32>
      %15 = arith.truncf %14 : vector<256x128xf32> to vector<256x128xbf16>
      %c0_13 = arith.constant 0 : index
      %c0_14 = arith.constant 0 : index
      %16 = vector.load %arg4[%c0_13, %c0_14] : memref<256x128xbf16, #tpu.memory_space<vmem>>, vector<256x128xbf16>
      tpu.vector_store %arg4[%c0_13, %c0_14], %15 {strides = array<i32>} : memref<256x128xbf16, #tpu.memory_space<vmem>>, vector<256x128xbf16>,
    } else {
    }
    return
  }
  func.func @transform_0(%arg0: i32, %arg1: i32) -> (i32, i32) {
    %c0_i32 = arith.constant 0 : i32
    %0 = arith.addi %arg0, %c0_i32 : i32
    %c0_i32_0 = arith.constant 0 : i32
    return %0, %arg1 : i32, i32
  }
  func.func @transform_1(%arg0: i32, %arg1: i32) -> (i32, i32) {
    %c0_i32 = arith.constant 0 : i32
    %c0_i32_0 = arith.constant 0 : i32
    return %arg1, %c0_i32 : i32, i32
  }
  func.func @transform_2(%arg0: i32, %arg1: i32) -> (i32, i32) {
    %c0_i32 = arith.constant 0 : i32
    %c0_i32_0 = arith.constant 0 : i32
    return %arg0, %c0_i32 : i32, i32
  }
}

module attributes {stable_mosaic.version = 11 : i64} {
  func.func @_spmm_kernel(%arg0: i32, %arg1: i32, %arg2: memref<128x256xbf16, #tpu.memory_space<vmem>>, %arg3: memref<256x128xbf16, #tpu.memory_space<vmem>>, %arg4: memref<128x128xf32, #tpu.memory_space<vmem>>, %arg5: memref<128x128xf32, #tpu.memory_space<vmem>>) attributes {dimension_semantics = [#tpu.dimension_semantics<parallel>, #tpu.dimension_semantics<arbitrary>], iteration_bounds = array<i64: 1, 1>, scalar_prefetch = 0 : i64, scratch_operands = 1 : i64, tpu.core_type = #tpu.core_type<tc>, window_params = [{transform_indices = @transform_0, window_bounds = array<i64: 128, 256>}, {transform_indices = @transform_1, window_bounds = array<i64: 256, 128>}, {transform_indices = @transform_2, window_bounds = array<i64: 128, 128>}]} {
    %c0_i32 = arith.constant 0 : i32
    %0 = arith.cmpi eq, %arg1, %c0_i32 : i32
    %1 = arith.extui %0 : i1 to i32
    %c0_i32_0 = arith.constant 0 : i32
    %2 = arith.cmpi ne, %1, %c0_i32_0 : i32
    scf.if %2 {
      %cst_10 = arith.constant 0.000000e+00 : f32
      %12 = vector.broadcast %cst_10 : f32 to vector<128x128xf32>
      %c0_11 = arith.constant 0 : index
      %c0_12 = arith.constant 0 : index
      %13 = vector.load %arg5[%c0_11, %c0_12] : memref<128x128xf32, #tpu.memory_space<vmem>>, vector<128x128xf32>
      tpu.vector_store %arg5[%c0_11, %c0_12], %12 {strides = array<i32>} : memref<128x128xf32, #tpu.memory_space<vmem>>, vector<128x128xf32>,
    } else {
    }
    %c0 = arith.constant 0 : index
    %c0_1 = arith.constant 0 : index
    %3 = vector.load %arg5[%c0, %c0_1] : memref<128x128xf32, #tpu.memory_space<vmem>>, vector<128x128xf32>
    %c0_2 = arith.constant 0 : index
    %c0_3 = arith.constant 0 : index
    %4 = vector.load %arg2[%c0_2, %c0_3] : memref<128x256xbf16, #tpu.memory_space<vmem>>, vector<128x256xbf16>
    %c0_4 = arith.constant 0 : index
    %c0_5 = arith.constant 0 : index
    %5 = vector.load %arg3[%c0_4, %c0_5] : memref<256x128xbf16, #tpu.memory_space<vmem>>, vector<256x128xbf16>
    %cst = arith.constant dense<0.000000e+00> : vector<128x128xf32>
    %6 = tpu.matmul %4, %5, %cst {dimension_numbers = #tpu.dot_dimension_numbers<[1], [0], [0], [1], [0, 0, 1, 1], [], []>} : vector<128x256xbf16>, vector<256x128xbf16>, vector<128x128xf32> -> vector<128x128xf32>
    %7 = arith.addf %3, %6 : vector<128x128xf32>
    %c0_6 = arith.constant 0 : index
    %c0_7 = arith.constant 0 : index
    %8 = vector.load %arg5[%c0_6, %c0_7] : memref<128x128xf32, #tpu.memory_space<vmem>>, vector<128x128xf32>
    tpu.vector_store %arg5[%c0_6, %c0_7], %7 {strides = array<i32>} : memref<128x128xf32, #tpu.memory_space<vmem>>, vector<128x128xf32>,
    %c0_i32_8 = arith.constant 0 : i32
    %9 = arith.cmpi eq, %arg1, %c0_i32_8 : i32
    %10 = arith.extui %9 : i1 to i32
    %c0_i32_9 = arith.constant 0 : i32
    %11 = arith.cmpi ne, %10, %c0_i32_9 : i32
    scf.if %11 {
      %c0_10 = arith.constant 0 : index
      %c0_11 = arith.constant 0 : index
      %12 = vector.load %arg5[%c0_10, %c0_11] : memref<128x128xf32, #tpu.memory_space<vmem>>, vector<128x128xf32>
      %c0_12 = arith.constant 0 : index
      %c0_13 = arith.constant 0 : index
      %13 = vector.load %arg4[%c0_12, %c0_13] : memref<128x128xf32, #tpu.memory_space<vmem>>, vector<128x128xf32>
      tpu.vector_store %arg4[%c0_12, %c0_13], %12 {strides = array<i32>} : memref<128x128xf32, #tpu.memory_space<vmem>>, vector<128x128xf32>,
    } else {
    }
    return
  }
  func.func @transform_0(%arg0: i32, %arg1: i32) -> (i32, i32) {
    %c1_i32 = arith.constant 1 : i32
    %0 = arith.addi %arg0, %c1_i32 : i32
    %c0_i32 = arith.constant 0 : i32
    return %0, %arg1 : i32, i32
  }
  func.func @transform_1(%arg0: i32, %arg1: i32) -> (i32, i32) {
    %c0_i32 = arith.constant 0 : i32
    %c0_i32_0 = arith.constant 0 : i32
    return %arg1, %c0_i32 : i32, i32
  }
  func.func @transform_2(%arg0: i32, %arg1: i32) -> (i32, i32) {
    %c0_i32 = arith.constant 0 : i32
    %c0_i32_0 = arith.constant 0 : i32
    return %arg0, %c0_i32 : i32, i32
  }
}

module attributes {stable_mosaic.version = 11 : i64} {
  func.func @_embed_score_ce_kernel(%arg0: i32, %arg1: memref<8x128xf32, #tpu.memory_space<vmem>>, %arg2: memref<128x128xf32, #tpu.memory_space<vmem>>, %arg3: memref<1x128xf32, #tpu.memory_space<vmem>>, %arg4: memref<128x128xf32, #tpu.memory_space<vmem>>, %arg5: memref<1x128xf32, #tpu.memory_space<vmem>>, %arg6: memref<128x128xf32, #tpu.memory_space<vmem>>, %arg7: memref<8x1xi32, #tpu.memory_space<vmem>>, %arg8: memref<8x128xf32, #tpu.memory_space<vmem>>, %arg9: memref<1x1xf32, #tpu.memory_space<smem>>) attributes {dimension_semantics = [#tpu.dimension_semantics<arbitrary>], iteration_bounds = array<i64: 1>, scalar_prefetch = 0 : i64, scratch_operands = 0 : i64, tpu.core_type = #tpu.core_type<tc>, window_params = [{pipeline_mode = #tpu.pipeline_mode<synchronous>, transform_indices = @transform_0, window_bounds = array<i64: 8, 128>}, {pipeline_mode = #tpu.pipeline_mode<synchronous>, transform_indices = @transform_1, window_bounds = array<i64: 128, 128>}, {pipeline_mode = #tpu.pipeline_mode<synchronous>, transform_indices = @transform_2, window_bounds = array<i64: 1, 128>}, {pipeline_mode = #tpu.pipeline_mode<synchronous>, transform_indices = @transform_3, window_bounds = array<i64: 128, 128>}, {pipeline_mode = #tpu.pipeline_mode<synchronous>, transform_indices = @transform_4, window_bounds = array<i64: 1, 128>}, {pipeline_mode = #tpu.pipeline_mode<synchronous>, transform_indices = @transform_5, window_bounds = array<i64: 128, 128>}, {pipeline_mode = #tpu.pipeline_mode<synchronous>, transform_indices = @transform_6, window_bounds = array<i64: 8, 1>}, {pipeline_mode = #tpu.pipeline_mode<synchronous>, transform_indices = @transform_7, window_bounds = array<i64: 8, 128>}, {transform_indices = @transform_8, window_bounds = array<i64: 1, 1>}]} {
    %c0 = arith.constant 0 : index
    %c0_0 = arith.constant 0 : index
    %0 = vector.load %arg1[%c0, %c0_0] : memref<8x128xf32, #tpu.memory_space<vmem>>, vector<8x128xf32>
    %c0_1 = arith.constant 0 : index
    %c0_2 = arith.constant 0 : index
    %1 = vector.load %arg2[%c0_1, %c0_2] : memref<128x128xf32, #tpu.memory_space<vmem>>, vector<128x128xf32>
    %cst = arith.constant dense<0.000000e+00> : vector<8x128xf32>
    %2 = tpu.matmul %0, %1, %cst {dimension_numbers = #tpu.dot_dimension_numbers<[1], [0], [0], [1], [0, 0, 1, 1], [], []>} : vector<8x128xf32>, vector<128x128xf32>, vector<8x128xf32> -> vector<8x128xf32>
    %c0_3 = arith.constant 0 : index
    %c0_4 = arith.constant 0 : index
    %3 = vector.load %arg3[%c0_3, %c0_4] : memref<1x128xf32, #tpu.memory_space<vmem>>, vector<1x128xf32>
    %4 = vector.broadcast %3 : vector<1x128xf32> to vector<8x128xf32>
    %5 = arith.addf %2, %4 : vector<8x128xf32>
    %cst_5 = arith.constant 0.000000e+00 : f32
    %6 = vector.broadcast %cst_5 : f32 to vector<8x128xf32>
    %7 = arith.maximumf %5, %6 : vector<8x128xf32>
    %c0_6 = arith.constant 0 : index
    %c0_7 = arith.constant 0 : index
    %8 = vector.load %arg4[%c0_6, %c0_7] : memref<128x128xf32, #tpu.memory_space<vmem>>, vector<128x128xf32>
    %cst_8 = arith.constant dense<0.000000e+00> : vector<8x128xf32>
    %9 = tpu.matmul %7, %8, %cst_8 {dimension_numbers = #tpu.dot_dimension_numbers<[1], [0], [0], [1], [0, 0, 1, 1], [], []>} : vector<8x128xf32>, vector<128x128xf32>, vector<8x128xf32> -> vector<8x128xf32>
    %c0_9 = arith.constant 0 : index
    %c0_10 = arith.constant 0 : index
    %10 = vector.load %arg5[%c0_9, %c0_10] : memref<1x128xf32, #tpu.memory_space<vmem>>, vector<1x128xf32>
    %11 = vector.broadcast %10 : vector<1x128xf32> to vector<8x128xf32>
    %12 = arith.addf %9, %11 : vector<8x128xf32>
    %cst_11 = arith.constant 0.000000e+00 : f32
    %13 = vector.broadcast %cst_11 : f32 to vector<8x128xf32>
    %14 = arith.maximumf %12, %13 : vector<8x128xf32>
    %c0_12 = arith.constant 0 : index
    %c0_13 = arith.constant 0 : index
    %15 = vector.load %arg6[%c0_12, %c0_13] : memref<128x128xf32, #tpu.memory_space<vmem>>, vector<128x128xf32>
    %cst_14 = arith.constant dense<0.000000e+00> : vector<8x128xf32>
    %16 = tpu.matmul %14, %15, %cst_14 {dimension_numbers = #tpu.dot_dimension_numbers<[1], [1], [0], [0], [0, 0, 1, 0], [], []>} : vector<8x128xf32>, vector<128x128xf32>, vector<8x128xf32> -> vector<8x128xf32>
    %17 = tpu.iota {dimensions = array<i32: 1>} : vector<8x128xi32>
    %c24_i32 = arith.constant 24 : i32
    %18 = vector.broadcast %c24_i32 : i32 to vector<8x128xi32>
    %19 = arith.cmpi slt, %17, %18 : vector<8x128xi32>
    %cst_15 = arith.constant -1.000000e+30 : f32
    %20 = vector.broadcast %cst_15 : f32 to vector<8x128xf32>
    %21 = arith.select %19, %16, %20 : vector<8x128xi1>, vector<8x128xf32>
    %c0_16 = arith.constant 0 : index
    %c0_17 = arith.constant 0 : index
    %22 = vector.load %arg8[%c0_16, %c0_17] : memref<8x128xf32, #tpu.memory_space<vmem>>, vector<8x128xf32>
    tpu.vector_store %arg8[%c0_16, %c0_17], %21 {strides = array<i32>} : memref<8x128xf32, #tpu.memory_space<vmem>>, vector<8x128xf32>,
    %cst_18 = arith.constant dense<0xFF800000> : vector<8xf32>
    %23 = vector.multi_reduction <maximumf>, %21, %cst_18 [1] : vector<8x128xf32> to vector<8xf32>
    %24 = vector.shape_cast %23 : vector<8xf32> to vector<8x1xf32>
    %25 = vector.broadcast %24 : vector<8x1xf32> to vector<8x128xf32>
    %26 = arith.subf %21, %25 : vector<8x128xf32>
    %27 = math.exp %26 : vector<8x128xf32>
    %cst_19 = arith.constant dense<0.000000e+00> : vector<8xf32>
    %28 = vector.multi_reduction <add>, %27, %cst_19 [1] : vector<8x128xf32> to vector<8xf32>
    %29 = vector.shape_cast %28 : vector<8xf32> to vector<8x1xf32>
    %30 = math.log %29 : vector<8x1xf32>
    %31 = arith.addf %30, %24 : vector<8x1xf32>
    %c0_20 = arith.constant 0 : index
    %c0_21 = arith.constant 0 : index
    %32 = vector.load %arg7[%c0_20, %c0_21] : memref<8x1xi32, #tpu.memory_space<vmem>>, vector<8x1xi32>
    %33 = vector.broadcast %32 : vector<8x1xi32> to vector<8x128xi32>
    %34 = arith.cmpi eq, %17, %33 : vector<8x128xi32>
    %cst_22 = arith.constant 0.000000e+00 : f32
    %35 = vector.broadcast %cst_22 : f32 to vector<8x128xf32>
    %36 = arith.select %34, %21, %35 : vector<8x128xi1>, vector<8x128xf32>
    %cst_23 = arith.constant dense<0.000000e+00> : vector<8xf32>
    %37 = vector.multi_reduction <add>, %36, %cst_23 [1] : vector<8x128xf32> to vector<8xf32>
    %38 = vector.shape_cast %37 : vector<8xf32> to vector<8x1xf32>
    %39 = arith.subf %31, %38 : vector<8x1xf32>
    %40 = vector.shape_cast %39 : vector<8x1xf32> to vector<1x8x1xf32>
    %cst_24 = arith.constant dense<0.000000e+00> : vector<1xf32>
    %41 = vector.multi_reduction <add>, %40, %cst_24 [1, 2] : vector<1x8x1xf32> to vector<1xf32>
    %42 = vector.shape_cast %41 : vector<1xf32> to vector<1x1x1xf32>
    %43 = vector.extract %42[0, 0, 0] : f32 from vector<1x1x1xf32>
    %cst_25 = arith.constant 8.000000e+00 : f32
    %44 = arith.divf %43, %cst_25 : f32
    %c0_26 = arith.constant 0 : index
    %c0_27 = arith.constant 0 : index
    %45 = memref.load %arg9[%c0_26, %c0_27] : memref<1x1xf32, #tpu.memory_space<smem>>
    memref.store %44, %arg9[%c0_26, %c0_27] : memref<1x1xf32, #tpu.memory_space<smem>>
    return
  }
  func.func @transform_0(%arg0: i32) -> (i32, i32) {
    %c0_i32 = arith.constant 0 : i32
    %c0_i32_0 = arith.constant 0 : i32
    %c0_i32_1 = arith.constant 0 : i32
    return %c0_i32, %c0_i32_0 : i32, i32
  }
  func.func @transform_1(%arg0: i32) -> (i32, i32) {
    %c0_i32 = arith.constant 0 : i32
    %c0_i32_0 = arith.constant 0 : i32
    %c0_i32_1 = arith.constant 0 : i32
    return %c0_i32, %c0_i32_0 : i32, i32
  }
  func.func @transform_2(%arg0: i32) -> (i32, i32) {
    %c0_i32 = arith.constant 0 : i32
    %c0_i32_0 = arith.constant 0 : i32
    %c0_i32_1 = arith.constant 0 : i32
    return %c0_i32, %c0_i32_0 : i32, i32
  }
  func.func @transform_3(%arg0: i32) -> (i32, i32) {
    %c0_i32 = arith.constant 0 : i32
    %c0_i32_0 = arith.constant 0 : i32
    %c0_i32_1 = arith.constant 0 : i32
    return %c0_i32, %c0_i32_0 : i32, i32
  }
  func.func @transform_4(%arg0: i32) -> (i32, i32) {
    %c0_i32 = arith.constant 0 : i32
    %c0_i32_0 = arith.constant 0 : i32
    %c0_i32_1 = arith.constant 0 : i32
    return %c0_i32, %c0_i32_0 : i32, i32
  }
  func.func @transform_5(%arg0: i32) -> (i32, i32) {
    %c0_i32 = arith.constant 0 : i32
    %c0_i32_0 = arith.constant 0 : i32
    %c0_i32_1 = arith.constant 0 : i32
    return %c0_i32, %c0_i32_0 : i32, i32
  }
  func.func @transform_6(%arg0: i32) -> (i32, i32) {
    %c0_i32 = arith.constant 0 : i32
    %c0_i32_0 = arith.constant 0 : i32
    %c0_i32_1 = arith.constant 0 : i32
    return %c0_i32, %c0_i32_0 : i32, i32
  }
  func.func @transform_7(%arg0: i32) -> (i32, i32) {
    %c0_i32 = arith.constant 0 : i32
    %c0_i32_0 = arith.constant 0 : i32
    %c0_i32_1 = arith.constant 0 : i32
    return %c0_i32, %c0_i32_0 : i32, i32
  }
  func.func @transform_8(%arg0: i32) -> (i32, i32) {
    %c0_i32 = arith.constant 0 : i32
    %c0_i32_0 = arith.constant 0 : i32
    %c0_i32_1 = arith.constant 0 : i32
    return %c0_i32, %c0_i32_0 : i32, i32
  }
}

</mosaic_0001>

<bundles_post_ra>
// kernel: graphfull_train_forward.7
= control target key start
LH: loop header
LB: loop body
LE: loop exit
PB: predicated region body
PF: predicated region fallthrough
CT: control target
= control target key end

     0   :  { %s959_s1 = inlined_call_operand.vmem [shape: bf16[128,128], index: 1, kind: input, shape index: {}]   ;;  %s960_s0 = inlined_call_operand.vmem [shape: bf16[256,128], index: 0, kind: input, shape index: {}]   ;;  %s961_s2 = inlined_call_operand.vmem [shape: bf16[256,128], index: 2, kind: output, shape index: {}]  }
   0x1   :  { %v800_v0 = vld [vmem:[%s959_s1] sm:$0xff]   ;;  %v801_v1 = vld [vmem:[%s959_s1 + $0x8] sm:$0xff]   ;;  %v802_v2 = vld [vmem:[%s959_s1 + $0x10] sm:$0xff]  }
   0x2   :  { %736 = vmatprep.subr.bf16.mxu0 %v800_v0  ;;  %784 = vmatprep.subr.bf16.mxu1 %v800_v0  ;;  %v803_v3 = vld [vmem:[%s959_s1 + $0x18] sm:$0xff]   ;;  %v808_v4 = vld [vmem:[%s960_s0] sm:$0xff]   ;;  %v805_v7 = vld [vmem:[%s959_s1 + $0x28] sm:$0xff]  }
   0x3   :  { %737 = vmatpush3.bf16.msra.mxu0 %v800_v0  ;;  %792 = vmatpush3.bf16.msra.mxu1 %v800_v0  ;;  %v809_v5 = vld [vmem:[%s960_s0 + $0x40] sm:$0xff]   ;;  %v806_v8 = vld [vmem:[%s959_s1 + $0x30] sm:$0xff]   ;;  %v807_v9 = vld [vmem:[%s959_s1 + $0x38] sm:$0xff]  }
   0x4   :  { %738 = vmatprep.subr.bf16.mxu0 %v801_v1  ;;  %785 = vmatprep.subr.bf16.mxu1 %v801_v1  ;;  %v804_v6 = vld [vmem:[%s959_s1 + $0x20] sm:$0xff]   ;;  %v810_v10 = vld [vmem:[%s960_s0 + $0x8] sm:$0xff]   ;;  %v812_v12 = vld [vmem:[%s960_s0 + $0x10] sm:$0xff]  }
   0x5   :  { %752 = vmatprep.mubr.bf16.mxu0 %v808_v4  ;;  %768 = vmatprep.mubr.bf16.mxu1 %v809_v5  ;;  %v811_v11 = vld [vmem:[%s960_s0 + $0x48] sm:$0xff]   ;;  %v813_v13 = vld [vmem:[%s960_s0 + $0x50] sm:$0xff]   ;;  %v814_v14 = vld [vmem:[%s960_s0 + $0x18] sm:$0xff]  }
   0x6   :  { %v815_v15 = vld [vmem:[%s960_s0 + $0x58] sm:$0xff]   ;;  %v816_v16 = vld [vmem:[%s960_s0 + $0x20] sm:$0xff]   ;;  %v818_v18 = vld [vmem:[%s960_s0 + $0x28] sm:$0xff]  }
   0x7   :  { %739 = vmatpush3.bf16.msra.mxu0 %v801_v1  ;;  %793 = vmatpush3.bf16.msra.mxu1 %v801_v1  ;;  %v817_v17 = vld [vmem:[%s960_s0 + $0x60] sm:$0xff]   ;;  %v819_v19 = vld [vmem:[%s960_s0 + $0x68] sm:$0xff]   ;;  %v820_v20 = vld [vmem:[%s960_s0 + $0x30] sm:$0xff]  }
   0x8   :  { %740 = vmatprep.subr.bf16.mxu0 %v802_v2  ;;  %786 = vmatprep.subr.bf16.mxu1 %v802_v2  ;;  %v821_v21 = vld [vmem:[%s960_s0 + $0x70] sm:$0xff]   ;;  %v822_v22 = vld [vmem:[%s960_s0 + $0x38] sm:$0xff]  }
   0x9   :  { %v823_v23 = vld [vmem:[%s960_s0 + $0x78] sm:$0xff]  }
   0xb   :  { %741 = vmatpush3.bf16.msra.mxu0 %v802_v2  ;;  %794 = vmatpush3.bf16.msra.mxu1 %v802_v2 }
   0xc   :  { %742 = vmatprep.subr.bf16.mxu0 %v803_v3  ;;  %787 = vmatprep.subr.bf16.mxu1 %v803_v3 }
   0xf   :  { %743 = vmatpush3.bf16.msra.mxu0 %v803_v3  ;;  %795 = vmatpush3.bf16.msra.mxu1 %v803_v3 }
  0x10   :  { %744 = vmatprep.subr.bf16.mxu0 %v804_v6  ;;  %788 = vmatprep.subr.bf16.mxu1 %v804_v6 }
  0x13   :  { %745 = vmatpush3.bf16.msra.mxu0 %v804_v6  ;;  %796 = vmatpush3.bf16.msra.mxu1 %v804_v6 }
  0x14   :  { %746 = vmatprep.subr.bf16.mxu0 %v805_v7  ;;  %789 = vmatprep.subr.bf16.mxu1 %v805_v7 }
  0x17   :  { %747 = vmatpush3.bf16.msra.mxu0 %v805_v7  ;;  %797 = vmatpush3.bf16.msra.mxu1 %v805_v7 }
  0x18   :  { %748 = vmatprep.subr.bf16.mxu0 %v806_v8  ;;  %790 = vmatprep.subr.bf16.mxu1 %v806_v8 }
  0x1b   :  { %749 = vmatpush3.bf16.msra.mxu0 %v806_v8  ;;  %798 = vmatpush3.bf16.msra.mxu1 %v806_v8 }
  0x1c   :  { %750 = vmatprep.subr.bf16.mxu0 %v807_v9  ;;  %791 = vmatprep.subr.bf16.mxu1 %v807_v9 }
  0x1f   :  { %751 = vmatpush3.bf16.msra.mxu0 %v807_v9  ;;  %799 = vmatpush3.bf16.msra.mxu1 %v807_v9 }
  0x22   :  { %753 = vmatmul.mubr.bf16.vlgmr.msra.gmra.mrb[0].mxu0 %v810_v10  ;;  %769 = vmatmul.mubr.bf16.vlgmr.msra.gmra.mrb[0].mxu1 %v811_v11 }
  0x23   :  { %756 = vmatprep.mubr.bf16.mxu0 %v812_v12  ;;  %772 = vmatprep.mubr.bf16.mxu1 %v813_v13 }
  0x2a   :  { %757 = vmatmul.mubr.bf16.gmra.mrb[4].mxu0 %v814_v14  ;;  %773 = vmatmul.mubr.bf16.gmra.mrb[4].mxu1 %v815_v15 }
  0x2b   :  { %760 = vmatprep.mubr.bf16.mxu0 %v816_v16  ;;  %776 = vmatprep.mubr.bf16.mxu1 %v817_v17 }
  0x32   :  { %761 = vmatmul.mubr.bf16.gmra.mrb[8].mxu0 %v818_v18  ;;  %777 = vmatmul.mubr.bf16.gmra.mrb[8].mxu1 %v819_v19 }
  0x33   :  { %764 = vmatprep.mubr.bf16.mxu0 %v820_v20  ;;  %780 = vmatprep.mubr.bf16.mxu1 %v821_v21 }
  0x3a   :  { %765 = vmatmul.mubr.bf16.gmra.mrb[12].mxu0 %v822_v22  ;;  %781 = vmatmul.mubr.bf16.gmra.mrb[12].mxu1 %v823_v23 }
  0xf5   :  { %v754_v24 = vpop.f32.mrb[0].mxu0  ;;  %v770_v25 = vpop.f32.mrb[0].mxu1 }
  0xf6   :  { %v238_v26 = vpop.f32.mrb[1].mxu0  ;;  %v302_v27 = vpop.f32.mrb[1].mxu1 }
  0xf7   :  { %v755_v28 = vpop.f32.mrb[2].mxu0  ;;  %v771_v29 = vpop.f32.mrb[2].mxu1 }
  0xf8   :  { %v625_v30 = vpack.c.bf16 %v755_v28, %v754_v24  ;;  %v665_v31 = vpack.c.bf16 %v771_v29, %v770_v25  ;;  %v241_v32 = vpop.f32.mrb[3].mxu0  ;;  %v305_v33 = vpop.f32.mrb[3].mxu1 }
  0xf9   :  { %v620_v34 = vpack.c.bf16 %v241_v32, %v238_v26  ;;  %v660_v35 = vpack.c.bf16 %v305_v33, %v302_v27 }
  0xfa   :  { %697 = vst [vmem:[%s961_s2 + $0x8] sm:$0xff] %v625_v30   ;;  %705 = vst [vmem:[%s961_s2 + $0x48] sm:$0xff] %v665_v31  }
  0xfb   :  { %621 = vst [vmem:[%s961_s2] sm:$0xff] %v620_v34   ;;  %704 = vst [vmem:[%s961_s2 + $0x40] sm:$0xff] %v660_v35  }
  0xfd   :  { %v758_v36 = vpop.f32.mrb[4].mxu0  ;;  %v774_v37 = vpop.f32.mrb[4].mxu1 }
  0xfe   :  { %v254_v38 = vpop.f32.mrb[5].mxu0  ;;  %v318_v39 = vpop.f32.mrb[5].mxu1 }
  0xff   :  { %v759_v40 = vpop.f32.mrb[6].mxu0  ;;  %v775_v41 = vpop.f32.mrb[6].mxu1 }
 0x100   :  { %v635_v42 = vpack.c.bf16 %v759_v40, %v758_v36  ;;  %v675_v43 = vpack.c.bf16 %v775_v41, %v774_v37  ;;  %v257_v44 = vpop.f32.mrb[7].mxu0  ;;  %v321_v45 = vpop.f32.mrb[7].mxu1 }
 0x101   :  { %v630_v46 = vpack.c.bf16 %v257_v44, %v254_v38  ;;  %v670_v47 = vpack.c.bf16 %v321_v45, %v318_v39 }
 0x102   :  { %699 = vst [vmem:[%s961_s2 + $0x18] sm:$0xff] %v635_v42   ;;  %707 = vst [vmem:[%s961_s2 + $0x58] sm:$0xff] %v675_v43  }
 0x103   :  { %698 = vst [vmem:[%s961_s2 + $0x10] sm:$0xff] %v630_v46   ;;  %706 = vst [vmem:[%s961_s2 + $0x50] sm:$0xff] %v670_v47  }
 0x105   :  { %v762_v48 = vpop.f32.mrb[8].mxu0  ;;  %v778_v49 = vpop.f32.mrb[8].mxu1 }
 0x106   :  { %v270_v50 = vpop.f32.mrb[9].mxu0  ;;  %v334_v51 = vpop.f32.mrb[9].mxu1 }
 0x107   :  { %v763_v52 = vpop.f32.mrb[10].mxu0  ;;  %v779_v53 = vpop.f32.mrb[10].mxu1 }
 0x108   :  { %v645_v54 = vpack.c.bf16 %v763_v52, %v762_v48  ;;  %v685_v55 = vpack.c.bf16 %v779_v53, %v778_v49  ;;  %v273_v56 = vpop.f32.mrb[11].mxu0  ;;  %v337_v57 = vpop.f32.mrb[11].mxu1 }
 0x109   :  { %v640_v58 = vpack.c.bf16 %v273_v56, %v270_v50  ;;  %v680_v59 = vpack.c.bf16 %v337_v57, %v334_v51 }
 0x10a   :  { %701 = vst [vmem:[%s961_s2 + $0x28] sm:$0xff] %v645_v54   ;;  %709 = vst [vmem:[%s961_s2 + $0x68] sm:$0xff] %v685_v55  }
 0x10b   :  { %700 = vst [vmem:[%s961_s2 + $0x20] sm:$0xff] %v640_v58   ;;  %708 = vst [vmem:[%s961_s2 + $0x60] sm:$0xff] %v680_v59  }
 0x10d   :  { %v766_v60 = vpop.f32.mrb[12].mxu0  ;;  %v782_v61 = vpop.f32.mrb[12].mxu1 }
 0x10e   :  { %v286_v62 = vpop.f32.mrb[13].mxu0  ;;  %v350_v63 = vpop.f32.mrb[13].mxu1 }
 0x10f   :  { %v767_v0 = vpop.f32.mrb[14].mxu0  ;;  %v783_v1 = vpop.f32.mrb[14].mxu1 }
 0x110   :  { %v655_v2 = vpack.c.bf16 %v767_v0, %v766_v60  ;;  %v695_v3 = vpack.c.bf16 %v783_v1, %v782_v61  ;;  %v289_v4 = vpop.f32.mrb[15].mxu0  ;;  %v353_v5 = vpop.f32.mrb[15].mxu1 }
 0x111   :  { %v650_v6 = vpack.c.bf16 %v289_v4, %v286_v62  ;;  %v690_v7 = vpack.c.bf16 %v353_v5, %v350_v63 }
 0x112   :  { %703 = vst [vmem:[%s961_s2 + $0x38] sm:$0xff] %v655_v2   ;;  %711 = vst [vmem:[%s961_s2 + $0x78] sm:$0xff] %v695_v3  }
 0x113   :  { %702 = vst [vmem:[%s961_s2 + $0x30] sm:$0xff] %v650_v6   ;;  %710 = vst [vmem:[%s961_s2 + $0x70] sm:$0xff] %v690_v7  }

// kernel: graphfull_train_forward.5
= control target key start
LH: loop header
LB: loop body
LE: loop exit
PB: predicated region body
PF: predicated region fallthrough
CT: control target
= control target key end

     0   :  { %7 = vsyncpa [#allocation3], 0  ;;  %s997_s0 = inlined_call_operand.hbm [shape: bf16[256,128], index: 0, kind: input, shape index: {}]   ;;  %s998_s1 = inlined_call_operand.hbm [shape: bf16[128,128], index: 1, kind: input, shape index: {}]   ;;  %s999_s2 = inlined_call_operand.vmem [shape: bf16[256,128], index: 2, kind: output, shape index: {}]  }
   0x1   :  { %8 = vsyncpa [#allocation5], 0  ;;  %s906_s9 = smov [#allocation2]   ;;  %s858_s13 = scalar_lea.hbm %s997_s0, 2048 }
   0x2   :  { %s14_s10 = sshll.u32 %s906_s9, 4  ;;  %p859_p0 = scmp.ne.s32.totalorder %s997_s0, %s858_s13  ;;  %s15_s10 = int_to_ptr.vmem [resolvable:$true] %s14_s10 }
   0x3   :  { %p862_p1 = scmp.lt.u32.totalorder %s858_s13, %s997_s0 }
   0x5   :  { %p864_p2 = pnand %p862_p1, %p859_p0 }
   0x7   :  { %867 = shalt.err (!%p864_p2)
}
   0x8   :  { %s868_s18 = scalar_lea.vmem %s15_s10, 2048  ;;  %p873_p4 = scmp.lt.s32.totalorder %s15_s10, %s15_s10 }
   0x9   :  { %p869_p3 = scmp.ne.s32.totalorder %s15_s10, %s868_s18  ;;  %p874_p5 = scmp.lt.s32.totalorder %s868_s18, %s868_s18 }
   0xb   :  { %p875_p6 = por %p874_p5, %p873_p4 }
   0xd   :  { %p876_p7 = pnand %p875_p6, %p869_p3 }
   0xf   :  { %879 = shalt.err (!%p876_p7)
}
  0x10   :  { %s907_s19 = smov 64   ;;  %s908_s20 = smov 4  }
  0x11   :  { %20 = dma.hbm_to_vmem [thread:$0]  %s997_s0, 2048, %s15_s10, [#allocation3], %s907_s19, %s907_s19, %s908_s20  }
  0x12   :  { %s909_s23 = smov [#allocation4]   ;;  %s880_s27 = scalar_lea.hbm %s998_s1, 1024 }
  0x13   :  { %s26_s24 = sshll.u32 %s909_s23, 4  ;;  %p881_p8 = scmp.ne.s32.totalorder %s998_s1, %s880_s27  ;;  %s27_s24 = int_to_ptr.vmem [resolvable:$true] %s26_s24 }
  0x14   :  { %p884_p9 = scmp.lt.u32.totalorder %s880_s27, %s998_s1 }
  0x16   :  { %p886_p10 = pnand %p884_p9, %p881_p8 }
  0x18   :  { %889 = shalt.err (!%p886_p10)
}
  0x19   :  { %s890_s4 = scalar_lea.vmem %s27_s24, 1024  ;;  %p895_p12 = scmp.lt.s32.totalorder %s27_s24, %s27_s24 }
  0x1a   :  { %p891_p11 = scmp.ne.s32.totalorder %s27_s24, %s890_s4  ;;  %p896_p13 = scmp.lt.s32.totalorder %s890_s4, %s890_s4 }
  0x1c   :  { %p897_p0 = por %p896_p13, %p895_p12 }
  0x1e   :  { %p898_p1 = pnand %p897_p0, %p891_p11 }
  0x20   :  { %901 = shalt.err (!%p898_p1)
}
  0x21   :  { %32 = dma.hbm_to_vmem [thread:$0]  %s998_s1, 1024, %s27_s24, [#allocation5], %s907_s19, %s907_s19, %s908_s20  }
  0x22   :  { %902 = dma.done.wait [#allocation3], 2048  }
  0x23   :  { %903 = vsyncadd [#allocation3], 4294965248 }
  0x24   :  { %904 = dma.done.wait [#allocation5], 1024  }
  0x25   :  { %905 = vsyncadd [#allocation5], 4294966272  ;;  %v834_v0 = vld [vmem:[#allocation4] sm:$0xff]   ;;  %v835_v1 = vld [vmem:[#allocation4 + $0x8] sm:$0xff]  }
  0x26   :  { %766 = vmatprep.subr.bf16.mxu0 %v834_v0  ;;  %814 = vmatprep.subr.bf16.mxu1 %v834_v0  ;;  %v836_v2 = vld [vmem:[#allocation4 + $0x10] sm:$0xff]   ;;  %v837_v3 = vld [vmem:[#allocation4 + $0x18] sm:$0xff]   ;;  %v842_v4 = vld [vmem:[#allocation2] sm:$0xff]  }
  0x27   :  { %767 = vmatpush3.bf16.msra.mxu0 %v834_v0  ;;  %822 = vmatpush3.bf16.msra.mxu1 %v834_v0  ;;  %v843_v5 = vld [vmem:[#allocation2 + $0x40] sm:$0xff]   ;;  %v839_v7 = vld [vmem:[#allocation4 + $0x28] sm:$0xff]   ;;  %v840_v8 = vld [vmem:[#allocation4 + $0x30] sm:$0xff]  }
  0x28   :  { %768 = vmatprep.subr.bf16.mxu0 %v835_v1  ;;  %815 = vmatprep.subr.bf16.mxu1 %v835_v1  ;;  %v838_v6 = vld [vmem:[#allocation4 + $0x20] sm:$0xff]   ;;  %v841_v9 = vld [vmem:[#allocation4 + $0x38] sm:$0xff]   ;;  %v844_v10 = vld [vmem:[#allocation2 + $0x8] sm:$0xff]  }
  0x29   :  { %782 = vmatprep.mubr.bf16.mxu0 %v842_v4  ;;  %798 = vmatprep.mubr.bf16.mxu1 %v843_v5  ;;  %v845_v11 = vld [vmem:[#allocation2 + $0x48] sm:$0xff]   ;;  %v846_v12 = vld [vmem:[#allocation2 + $0x10] sm:$0xff]   ;;  %v848_v14 = vld [vmem:[#allocation2 + $0x18] sm:$0xff]  }
  0x2a   :  { %v847_v13 = vld [vmem:[#allocation2 + $0x50] sm:$0xff]   ;;  %v849_v15 = vld [vmem:[#allocation2 + $0x58] sm:$0xff]   ;;  %v850_v16 = vld [vmem:[#allocation2 + $0x20] sm:$0xff]  }
  0x2b   :  { %769 = vmatpush3.bf16.msra.mxu0 %v835_v1  ;;  %823 = vmatpush3.bf16.msra.mxu1 %v835_v1  ;;  %v851_v17 = vld [vmem:[#allocation2 + $0x60] sm:$0xff]   ;;  %v852_v18 = vld [vmem:[#allocation2 + $0x28] sm:$0xff]   ;;  %v854_v20 = vld [vmem:[#allocation2 + $0x30] sm:$0xff]  }
  0x2c   :  { %770 = vmatprep.subr.bf16.mxu0 %v836_v2  ;;  %816 = vmatprep.subr.bf16.mxu1 %v836_v2  ;;  %v853_v19 = vld [vmem:[#allocation2 + $0x68] sm:$0xff]   ;;  %v855_v21 = vld [vmem:[#allocation2 + $0x70] sm:$0xff]   ;;  %v856_v22 = vld [vmem:[#allocation2 + $0x38] sm:$0xff]  }
  0x2d   :  { %v857_v23 = vld [vmem:[#allocation2 + $0x78] sm:$0xff]  }
  0x2f   :  { %771 = vmatpush3.bf16.msra.mxu0 %v836_v2  ;;  %824 = vmatpush3.bf16.msra.mxu1 %v836_v2 }
  0x30   :  { %772 = vmatprep.subr.bf16.mxu0 %v837_v3  ;;  %817 = vmatprep.subr.bf16.mxu1 %v837_v3 }
  0x33   :  { %773 = vmatpush3.bf16.msra.mxu0 %v837_v3  ;;  %825 = vmatpush3.bf16.msra.mxu1 %v837_v3 }
  0x34   :  { %774 = vmatprep.subr.bf16.mxu0 %v838_v6  ;;  %818 = vmatprep.subr.bf16.mxu1 %v838_v6 }
  0x37   :  { %775 = vmatpush3.bf16.msra.mxu0 %v838_v6  ;;  %826 = vmatpush3.bf16.msra.mxu1 %v838_v6 }
  0x38   :  { %776 = vmatprep.subr.bf16.mxu0 %v839_v7  ;;  %819 = vmatprep.subr.bf16.mxu1 %v839_v7 }
  0x3b   :  { %777 = vmatpush3.bf16.msra.mxu0 %v839_v7  ;;  %827 = vmatpush3.bf16.msra.mxu1 %v839_v7 }
  0x3c   :  { %778 = vmatprep.subr.bf16.mxu0 %v840_v8  ;;  %820 = vmatprep.subr.bf16.mxu1 %v840_v8 }
  0x3f   :  { %779 = vmatpush3.bf16.msra.mxu0 %v840_v8  ;;  %828 = vmatpush3.bf16.msra.mxu1 %v840_v8 }
  0x40   :  { %780 = vmatprep.subr.bf16.mxu0 %v841_v9  ;;  %821 = vmatprep.subr.bf16.mxu1 %v841_v9 }
  0x43   :  { %781 = vmatpush3.bf16.msra.mxu0 %v841_v9  ;;  %829 = vmatpush3.bf16.msra.mxu1 %v841_v9 }
  0x46   :  { %783 = vmatmul.mubr.bf16.vlgmr.msra.gmra.mrb[0].mxu0 %v844_v10  ;;  %799 = vmatmul.mubr.bf16.vlgmr.msra.gmra.mrb[0].mxu1 %v845_v11 }
  0x47   :  { %786 = vmatprep.mubr.bf16.mxu0 %v846_v12  ;;  %802 = vmatprep.mubr.bf16.mxu1 %v847_v13 }
  0x4e   :  { %787 = vmatmul.mubr.bf16.gmra.mrb[4].mxu0 %v848_v14  ;;  %803 = vmatmul.mubr.bf16.gmra.mrb[4].mxu1 %v849_v15 }
  0x4f   :  { %790 = vmatprep.mubr.bf16.mxu0 %v850_v16  ;;  %806 = vmatprep.mubr.bf16.mxu1 %v851_v17 }
  0x56   :  { %791 = vmatmul.mubr.bf16.gmra.mrb[8].mxu0 %v852_v18  ;;  %807 = vmatmul.mubr.bf16.gmra.mrb[8].mxu1 %v853_v19 }
  0x57   :  { %794 = vmatprep.mubr.bf16.mxu0 %v854_v20  ;;  %810 = vmatprep.mubr.bf16.mxu1 %v855_v21 }
  0x5e   :  { %795 = vmatmul.mubr.bf16.gmra.mrb[12].mxu0 %v856_v22  ;;  %811 = vmatmul.mubr.bf16.gmra.mrb[12].mxu1 %v857_v23 }
 0x119   :  { %v784_v24 = vpop.f32.mrb[0].mxu0  ;;  %v800_v25 = vpop.f32.mrb[0].mxu1 }
 0x11a   :  { %v266_v26 = vpop.f32.mrb[1].mxu0  ;;  %v330_v27 = vpop.f32.mrb[1].mxu1 }
 0x11b   :  { %v785_v28 = vpop.f32.mrb[2].mxu0  ;;  %v801_v29 = vpop.f32.mrb[2].mxu1 }
 0x11c   :  { %v655_v30 = vpack.c.bf16 %v785_v28, %v784_v24  ;;  %v695_v31 = vpack.c.bf16 %v801_v29, %v800_v25  ;;  %v269_v32 = vpop.f32.mrb[3].mxu0  ;;  %v333_v33 = vpop.f32.mrb[3].mxu1 }
 0x11d   :  { %v650_v34 = vpack.c.bf16 %v269_v32, %v266_v26  ;;  %v690_v35 = vpack.c.bf16 %v333_v33, %v330_v27 }
 0x11e   :  { %727 = vst [vmem:[%s999_s2 + $0x8] sm:$0xff] %v655_v30   ;;  %735 = vst [vmem:[%s999_s2 + $0x48] sm:$0xff] %v695_v31  }
 0x11f   :  { %651 = vst [vmem:[%s999_s2] sm:$0xff] %v650_v34   ;;  %734 = vst [vmem:[%s999_s2 + $0x40] sm:$0xff] %v690_v35  }
 0x121   :  { %v788_v36 = vpop.f32.mrb[4].mxu0  ;;  %v804_v37 = vpop.f32.mrb[4].mxu1 }
 0x122   :  { %v282_v38 = vpop.f32.mrb[5].mxu0  ;;  %v346_v39 = vpop.f32.mrb[5].mxu1 }
 0x123   :  { %v789_v40 = vpop.f32.mrb[6].mxu0  ;;  %v805_v41 = vpop.f32.mrb[6].mxu1 }
 0x124   :  { %v665_v42 = vpack.c.bf16 %v789_v40, %v788_v36  ;;  %v705_v43 = vpack.c.bf16 %v805_v41, %v804_v37  ;;  %v285_v44 = vpop.f32.mrb[7].mxu0  ;;  %v349_v45 = vpop.f32.mrb[7].mxu1 }
 0x125   :  { %v660_v46 = vpack.c.bf16 %v285_v44, %v282_v38  ;;  %v700_v47 = vpack.c.bf16 %v349_v45, %v346_v39 }
 0x126   :  { %729 = vst [vmem:[%s999_s2 + $0x18] sm:$0xff] %v665_v42   ;;  %737 = vst [vmem:[%s999_s2 + $0x58] sm:$0xff] %v705_v43  }
 0x127   :  { %728 = vst [vmem:[%s999_s2 + $0x10] sm:$0xff] %v660_v46   ;;  %736 = vst [vmem:[%s999_s2 + $0x50] sm:$0xff] %v700_v47  }
 0x129   :  { %v792_v48 = vpop.f32.mrb[8].mxu0  ;;  %v808_v49 = vpop.f32.mrb[8].mxu1 }
 0x12a   :  { %v298_v50 = vpop.f32.mrb[9].mxu0  ;;  %v362_v51 = vpop.f32.mrb[9].mxu1 }
 0x12b   :  { %v793_v52 = vpop.f32.mrb[10].mxu0  ;;  %v809_v53 = vpop.f32.mrb[10].mxu1 }
 0x12c   :  { %v675_v54 = vpack.c.bf16 %v793_v52, %v792_v48  ;;  %v715_v55 = vpack.c.bf16 %v809_v53, %v808_v49  ;;  %v301_v56 = vpop.f32.mrb[11].mxu0  ;;  %v365_v57 = vpop.f32.mrb[11].mxu1 }
 0x12d   :  { %v670_v58 = vpack.c.bf16 %v301_v56, %v298_v50  ;;  %v710_v59 = vpack.c.bf16 %v365_v57, %v362_v51 }
 0x12e   :  { %731 = vst [vmem:[%s999_s2 + $0x28] sm:$0xff] %v675_v54   ;;  %739 = vst [vmem:[%s999_s2 + $0x68] sm:$0xff] %v715_v55  }
 0x12f   :  { %730 = vst [vmem:[%s999_s2 + $0x20] sm:$0xff] %v670_v58   ;;  %738 = vst [vmem:[%s999_s2 + $0x60] sm:$0xff] %v710_v59  }
 0x131   :  { %v796_v60 = vpop.f32.mrb[12].mxu0  ;;  %v812_v61 = vpop.f32.mrb[12].mxu1 }
 0x132   :  { %v314_v62 = vpop.f32.mrb[13].mxu0  ;;  %v378_v63 = vpop.f32.mrb[13].mxu1 }
 0x133   :  { %v797_v0 = vpop.f32.mrb[14].mxu0  ;;  %v813_v1 = vpop.f32.mrb[14].mxu1 }
 0x134   :  { %v685_v2 = vpack.c.bf16 %v797_v0, %v796_v60  ;;  %v725_v3 = vpack.c.bf16 %v813_v1, %v812_v61  ;;  %v317_v4 = vpop.f32.mrb[15].mxu0  ;;  %v381_v5 = vpop.f32.mrb[15].mxu1 }
 0x135   :  { %v680_v6 = vpack.c.bf16 %v317_v4, %v314_v62  ;;  %v720_v7 = vpack.c.bf16 %v381_v5, %v378_v63 }
 0x136   :  { %733 = vst [vmem:[%s999_s2 + $0x38] sm:$0xff] %v685_v2   ;;  %741 = vst [vmem:[%s999_s2 + $0x78] sm:$0xff] %v725_v3  }
 0x137   :  { %732 = vst [vmem:[%s999_s2 + $0x30] sm:$0xff] %v680_v6   ;;  %740 = vst [vmem:[%s999_s2 + $0x70] sm:$0xff] %v720_v7  }
 0x138   :  { %557 = vsyncpa [#allocation3], 1 }
 0x139   :  { %558 = vsyncpa [#allocation5], 1 }

// kernel: graphfull_train_forward.8
= control target key start
LH: loop header
LB: loop body
LE: loop exit
PB: predicated region body
PF: predicated region fallthrough
CT: control target
= control target key end

     0   :  { %s798_s1 = inlined_call_operand.vmem [shape: bf16[256,128], index: 1, kind: input, shape index: {}]   ;;  %s799_s0 = inlined_call_operand.vmem [shape: bf16[256,256], index: 0, kind: input, shape index: {}]   ;;  %s800_s2 = inlined_call_operand.vmem [shape: f32[128,128], index: 2, kind: output, shape index: {}]  }
   0x1   :  { %v599_v0 = vld [vmem:[%s798_s1 + $0x40] sm:$0xff]   ;;  %v601_v2 = vld [vmem:[%s798_s1 + $0x48] sm:$0xff]   ;;  %v603_v4 = vld [vmem:[%s798_s1 + $0x50] sm:$0xff]  }
   0x2   :  { %v600_v1 = vld [vmem:[%s798_s1] sm:$0xff]   ;;  %519 = vmatprep.subr.bf16.mxu0 %v599_v0  ;;  %583 = vmatprep.subr.bf16.mxu1 %v599_v0  ;;  %v602_v3 = vld [vmem:[%s798_s1 + $0x8] sm:$0xff]   ;;  %v604_v5 = vld [vmem:[%s798_s1 + $0x10] sm:$0xff]  }
   0x3   :  { %520 = vmatpush3.bf16.msra.mxu0 %v600_v1  ;;  %591 = vmatpush3.bf16.msra.mxu1 %v600_v1  ;;  %v605_v6 = vld [vmem:[%s798_s1 + $0x58] sm:$0xff]   ;;  %v607_v8 = vld [vmem:[%s798_s1 + $0x60] sm:$0xff]   ;;  %v609_v10 = vld [vmem:[%s798_s1 + $0x68] sm:$0xff]  }
   0x4   :  { %521 = vmatprep.subr.bf16.mxu0 %v601_v2  ;;  %584 = vmatprep.subr.bf16.mxu1 %v601_v2  ;;  %v606_v7 = vld [vmem:[%s798_s1 + $0x18] sm:$0xff]   ;;  %v608_v9 = vld [vmem:[%s798_s1 + $0x20] sm:$0xff]   ;;  %v610_v13 = vld [vmem:[%s798_s1 + $0x28] sm:$0xff]  }
   0x5   :  { %v617_v11 = vld [vmem:[%s799_s0 + $0x84] ss:$8 sps:$4 sm:$0xff]   ;;  %v611_v14 = vld [vmem:[%s798_s1 + $0x70] sm:$0xff]   ;;  %v613_v16 = vld [vmem:[%s798_s1 + $0x78] sm:$0xff]  }
   0x6   :  { %v620_v12 = vld [vmem:[%s799_s0 + $0xc4] ss:$8 sps:$4 sm:$0xff]   ;;  %329 = vmatprep.mubr.bf16.mxu0 %v617_v11  ;;  %v612_v15 = vld [vmem:[%s798_s1 + $0x30] sm:$0xff]   ;;  %v614_v17 = vld [vmem:[%s798_s1 + $0x38] sm:$0xff]  }
   0x7   :  { %522 = vmatpush3.bf16.msra.mxu0 %v602_v3  ;;  %592 = vmatpush3.bf16.msra.mxu1 %v602_v3  ;;  %v615_v18 = vld [vmem:[%s799_s0 + $0x80] ss:$8 sps:$4 sm:$0xff]   ;;  %v621_v20 = vld [vmem:[%s799_s0 + $0x94] ss:$8 sps:$4 sm:$0xff]   ;;  %v625_v22 = vld [vmem:[%s799_s0 + $0x90] ss:$8 sps:$4 sm:$0xff]  }
   0x8   :  { %523 = vmatprep.subr.bf16.mxu0 %v603_v4  ;;  %585 = vmatprep.subr.bf16.mxu1 %v603_v4  ;;  %v618_v19 = vld [vmem:[%s799_s0 + $0xc0] ss:$8 sps:$4 sm:$0xff]   ;;  %v623_v21 = vld [vmem:[%s799_s0 + $0xd4] ss:$8 sps:$4 sm:$0xff]   ;;  %v626_v23 = vld [vmem:[%s799_s0 + $0xd0] ss:$8 sps:$4 sm:$0xff]  }
   0x9   :  { %361 = vmatprep.mubr.bf16.mxu1 %v620_v12  ;;  %v627_v24 = vld [vmem:[%s799_s0 + $0xa4] ss:$8 sps:$4 sm:$0xff]   ;;  %v631_v26 = vld [vmem:[%s799_s0 + $0xa0] ss:$8 sps:$4 sm:$0xff]   ;;  %v633_v28 = vld [vmem:[%s799_s0 + $0xb4] ss:$8 sps:$4 sm:$0xff]  }
   0xa   :  { %v629_v25 = vld [vmem:[%s799_s0 + $0xe4] ss:$8 sps:$4 sm:$0xff]   ;;  %v632_v27 = vld [vmem:[%s799_s0 + $0xe0] ss:$8 sps:$4 sm:$0xff]   ;;  %v635_v29 = vld [vmem:[%s799_s0 + $0xf4] ss:$8 sps:$4 sm:$0xff]  }
   0xb   :  { %524 = vmatpush3.bf16.msra.mxu0 %v604_v5  ;;  %593 = vmatpush3.bf16.msra.mxu1 %v604_v5  ;;  %v637_v30 = vld [vmem:[%s799_s0 + $0xb0] ss:$8 sps:$4 sm:$0xff]  }
   0xc   :  { %525 = vmatprep.subr.bf16.mxu0 %v605_v6  ;;  %586 = vmatprep.subr.bf16.mxu1 %v605_v6  ;;  %v638_v31 = vld [vmem:[%s799_s0 + $0xf0] ss:$8 sps:$4 sm:$0xff]  }
   0xf   :  { %526 = vmatpush3.bf16.msra.mxu0 %v606_v7  ;;  %594 = vmatpush3.bf16.msra.mxu1 %v606_v7 }
  0x10   :  { %527 = vmatprep.subr.bf16.mxu0 %v607_v8  ;;  %587 = vmatprep.subr.bf16.mxu1 %v607_v8 }
  0x13   :  { %528 = vmatpush3.bf16.msra.mxu0 %v608_v9  ;;  %595 = vmatpush3.bf16.msra.mxu1 %v608_v9 }
  0x14   :  { %529 = vmatprep.subr.bf16.mxu0 %v609_v10  ;;  %588 = vmatprep.subr.bf16.mxu1 %v609_v10 }
  0x17   :  { %530 = vmatpush3.bf16.msra.mxu0 %v610_v13  ;;  %596 = vmatpush3.bf16.msra.mxu1 %v610_v13 }
  0x18   :  { %531 = vmatprep.subr.bf16.mxu0 %v611_v14  ;;  %589 = vmatprep.subr.bf16.mxu1 %v611_v14 }
  0x1b   :  { %532 = vmatpush3.bf16.msra.mxu0 %v612_v15  ;;  %597 = vmatpush3.bf16.msra.mxu1 %v612_v15 }
  0x1c   :  { %533 = vmatprep.subr.bf16.mxu0 %v613_v16  ;;  %590 = vmatprep.subr.bf16.mxu1 %v613_v16 }
  0x1f   :  { %534 = vmatpush3.bf16.msra.mxu0 %v614_v17  ;;  %598 = vmatpush3.bf16.msra.mxu1 %v614_v17 }
  0x22   :  { %330 = vmatmul.mubr.bf16.vlgmr.msra.gmra.mrb[0].mxu0 %v615_v18  ;;  %362 = vmatmul.mubr.bf16.vlgmr.msra.gmra.mrb[0].mxu1 %v618_v19 }
  0x23   :  { %337 = vmatprep.mubr.bf16.mxu0 %v621_v20  ;;  %369 = vmatprep.mubr.bf16.mxu1 %v623_v21 }
  0x2a   :  { %338 = vmatmul.mubr.bf16.gmra.mrb[4].mxu0 %v625_v22  ;;  %370 = vmatmul.mubr.bf16.gmra.mrb[4].mxu1 %v626_v23 }
  0x2b   :  { %345 = vmatprep.mubr.bf16.mxu0 %v627_v24  ;;  %377 = vmatprep.mubr.bf16.mxu1 %v629_v25 }
  0x32   :  { %346 = vmatmul.mubr.bf16.gmra.mrb[8].mxu0 %v631_v26  ;;  %378 = vmatmul.mubr.bf16.gmra.mrb[8].mxu1 %v632_v27 }
  0x33   :  { %353 = vmatprep.mubr.bf16.mxu0 %v633_v28  ;;  %385 = vmatprep.mubr.bf16.mxu1 %v635_v29 }
  0x3a   :  { %354 = vmatmul.mubr.bf16.gmra.mrb[12].mxu0 %v637_v30  ;;  %386 = vmatmul.mubr.bf16.gmra.mrb[12].mxu1 %v638_v31 }
  0xf5   :  { %v535_v32 = vpop.f32.mrb[0].mxu0  ;;  %v559_v33 = vpop.f32.mrb[0].mxu1 }
  0xf6   :  { %v536_v34 = vpop.f32.mrb[1].mxu0  ;;  %v560_v35 = vpop.f32.mrb[1].mxu1 }
  0xf7   :  { %v537_v36 = vadd.f32 %v536_v34, %v535_v32  ;;  %v561_v37 = vadd.f32 %v560_v35, %v559_v33  ;;  %v538_v38 = vpop.f32.mrb[2].mxu0  ;;  %v562_v39 = vpop.f32.mrb[2].mxu1 }
  0xf8   :  { %v539_v40 = vpop.f32.mrb[3].mxu0  ;;  %v563_v41 = vpop.f32.mrb[3].mxu1 }
  0xf9   :  { %445 = vst [vmem:[%s800_s2] sm:$0xff] %v537_v36  ;;  %453 = vst [vmem:[%s800_s2 + $0x40] sm:$0xff] %v561_v37  ;;  %v540_v42 = vadd.f32 %v539_v40, %v538_v38  ;;  %v564_v43 = vadd.f32 %v563_v41, %v562_v39 }
  0xfb   :  { %446 = vst [vmem:[%s800_s2 + $0x8] sm:$0xff] %v540_v42  ;;  %454 = vst [vmem:[%s800_s2 + $0x48] sm:$0xff] %v564_v43 }
  0xfd   :  { %v541_v44 = vpop.f32.mrb[4].mxu0  ;;  %v565_v45 = vpop.f32.mrb[4].mxu1 }
  0xfe   :  { %v542_v46 = vpop.f32.mrb[5].mxu0  ;;  %v566_v47 = vpop.f32.mrb[5].mxu1 }
  0xff   :  { %v543_v48 = vadd.f32 %v542_v46, %v541_v44  ;;  %v567_v49 = vadd.f32 %v566_v47, %v565_v45  ;;  %v544_v50 = vpop.f32.mrb[6].mxu0  ;;  %v568_v51 = vpop.f32.mrb[6].mxu1 }
 0x100   :  { %v545_v52 = vpop.f32.mrb[7].mxu0  ;;  %v569_v53 = vpop.f32.mrb[7].mxu1 }
 0x101   :  { %447 = vst [vmem:[%s800_s2 + $0x10] sm:$0xff] %v543_v48  ;;  %455 = vst [vmem:[%s800_s2 + $0x50] sm:$0xff] %v567_v49  ;;  %v546_v54 = vadd.f32 %v545_v52, %v544_v50  ;;  %v570_v55 = vadd.f32 %v569_v53, %v568_v51 }
 0x103   :  { %448 = vst [vmem:[%s800_s2 + $0x18] sm:$0xff] %v546_v54  ;;  %456 = vst [vmem:[%s800_s2 + $0x58] sm:$0xff] %v570_v55 }
 0x105   :  { %v547_v56 = vpop.f32.mrb[8].mxu0  ;;  %v571_v57 = vpop.f32.mrb[8].mxu1 }
 0x106   :  { %v548_v58 = vpop.f32.mrb[9].mxu0  ;;  %v572_v59 = vpop.f32.mrb[9].mxu1 }
 0x107   :  { %v549_v60 = vadd.f32 %v548_v58, %v547_v56  ;;  %v573_v61 = vadd.f32 %v572_v59, %v571_v57  ;;  %v550_v62 = vpop.f32.mrb[10].mxu0  ;;  %v574_v63 = vpop.f32.mrb[10].mxu1 }
 0x108   :  { %v551_v0 = vpop.f32.mrb[11].mxu0  ;;  %v575_v1 = vpop.f32.mrb[11].mxu1 }
 0x109   :  { %449 = vst [vmem:[%s800_s2 + $0x20] sm:$0xff] %v549_v60  ;;  %457 = vst [vmem:[%s800_s2 + $0x60] sm:$0xff] %v573_v61  ;;  %v552_v2 = vadd.f32 %v551_v0, %v550_v62  ;;  %v576_v3 = vadd.f32 %v575_v1, %v574_v63 }
 0x10b   :  { %450 = vst [vmem:[%s800_s2 + $0x28] sm:$0xff] %v552_v2  ;;  %458 = vst [vmem:[%s800_s2 + $0x68] sm:$0xff] %v576_v3 }
 0x10d   :  { %v553_v4 = vpop.f32.mrb[12].mxu0  ;;  %v577_v5 = vpop.f32.mrb[12].mxu1 }
 0x10e   :  { %v554_v6 = vpop.f32.mrb[13].mxu0  ;;  %v578_v7 = vpop.f32.mrb[13].mxu1 }
 0x10f   :  { %v555_v8 = vadd.f32 %v554_v6, %v553_v4  ;;  %v579_v9 = vadd.f32 %v578_v7, %v577_v5  ;;  %v556_v10 = vpop.f32.mrb[14].mxu0  ;;  %v580_v11 = vpop.f32.mrb[14].mxu1 }
 0x110   :  { %v557_v12 = vpop.f32.mrb[15].mxu0  ;;  %v581_v13 = vpop.f32.mrb[15].mxu1 }
 0x111   :  { %451 = vst [vmem:[%s800_s2 + $0x30] sm:$0xff] %v555_v8  ;;  %459 = vst [vmem:[%s800_s2 + $0x70] sm:$0xff] %v579_v9  ;;  %v558_v14 = vadd.f32 %v557_v12, %v556_v10  ;;  %v582_v15 = vadd.f32 %v581_v13, %v580_v11 }
 0x113   :  { %452 = vst [vmem:[%s800_s2 + $0x38] sm:$0xff] %v558_v14  ;;  %460 = vst [vmem:[%s800_s2 + $0x78] sm:$0xff] %v582_v15 }

// kernel: graphfull_train_forward.6
= control target key start
LH: loop header
LB: loop body
LE: loop exit
PB: predicated region body
PF: predicated region fallthrough
CT: control target
= control target key end

     0   :  { %s1462_s1 = inlined_call_operand.vmem [shape: bf16[256,128], index: 1, kind: input, shape index: {}]   ;;  %s1463_s0 = inlined_call_operand.vmem [shape: bf16[256,256], index: 0, kind: input, shape index: {}]   ;;  %s1464_s2 = inlined_call_operand.vmem [shape: bf16[256,128], index: 2, kind: output, shape index: {}]  }
   0x1   :  { %v1191_v0 = vld [vmem:[%s1462_s1 + $0x40] sm:$0xff]   ;;  %v1193_v2 = vld [vmem:[%s1462_s1 + $0x48] sm:$0xff]   ;;  %v1195_v4 = vld [vmem:[%s1462_s1 + $0x50] sm:$0xff]  }
   0x2   :  { %v1192_v1 = vld [vmem:[%s1462_s1] sm:$0xff]   ;;  %1063 = vmatprep.subr.bf16.mxu0 %v1191_v0  ;;  %1175 = vmatprep.subr.bf16.mxu1 %v1191_v0  ;;  %v1194_v3 = vld [vmem:[%s1462_s1 + $0x8] sm:$0xff]   ;;  %v1196_v5 = vld [vmem:[%s1462_s1 + $0x10] sm:$0xff]  }
   0x3   :  { %1064 = vmatpush3.bf16.msra.mxu0 %v1192_v1  ;;  %1183 = vmatpush3.bf16.msra.mxu1 %v1192_v1  ;;  %v1197_v6 = vld [vmem:[%s1462_s1 + $0x58] sm:$0xff]   ;;  %v1199_v8 = vld [vmem:[%s1462_s1 + $0x60] sm:$0xff]   ;;  %v1201_v10 = vld [vmem:[%s1462_s1 + $0x68] sm:$0xff]  }
   0x4   :  { %1065 = vmatprep.subr.bf16.mxu0 %v1193_v2  ;;  %1176 = vmatprep.subr.bf16.mxu1 %v1193_v2  ;;  %v1198_v7 = vld [vmem:[%s1462_s1 + $0x18] sm:$0xff]   ;;  %v1200_v9 = vld [vmem:[%s1462_s1 + $0x20] sm:$0xff]   ;;  %v1202_v13 = vld [vmem:[%s1462_s1 + $0x28] sm:$0xff]  }
   0x5   :  { %v1209_v11 = vld [vmem:[%s1463_s0 + $0x4] ss:$8 sps:$4 sm:$0xff]   ;;  %v1203_v14 = vld [vmem:[%s1462_s1 + $0x70] sm:$0xff]   ;;  %v1205_v16 = vld [vmem:[%s1462_s1 + $0x78] sm:$0xff]  }
   0x6   :  { %v1212_v12 = vld [vmem:[%s1463_s0 + $0x84] ss:$8 sps:$4 sm:$0xff]   ;;  %432 = vmatprep.mubr.bf16.mxu0 %v1209_v11  ;;  %v1204_v15 = vld [vmem:[%s1462_s1 + $0x30] sm:$0xff]   ;;  %v1206_v17 = vld [vmem:[%s1462_s1 + $0x38] sm:$0xff]  }
   0x7   :  { %1066 = vmatpush3.bf16.msra.mxu0 %v1194_v3  ;;  %1184 = vmatpush3.bf16.msra.mxu1 %v1194_v3  ;;  %v1207_v18 = vld [vmem:[%s1463_s0] ss:$8 sps:$4 sm:$0xff]   ;;  %v1213_v20 = vld [vmem:[%s1463_s0 + $0x14] ss:$8 sps:$4 sm:$0xff]   ;;  %v1217_v22 = vld [vmem:[%s1463_s0 + $0x10] ss:$8 sps:$4 sm:$0xff]  }
   0x8   :  { %1067 = vmatprep.subr.bf16.mxu0 %v1195_v4  ;;  %1177 = vmatprep.subr.bf16.mxu1 %v1195_v4  ;;  %v1210_v19 = vld [vmem:[%s1463_s0 + $0x80] ss:$8 sps:$4 sm:$0xff]   ;;  %v1215_v21 = vld [vmem:[%s1463_s0 + $0x94] ss:$8 sps:$4 sm:$0xff]   ;;  %v1218_v23 = vld [vmem:[%s1463_s0 + $0x90] ss:$8 sps:$4 sm:$0xff]  }
   0x9   :  { %496 = vmatprep.mubr.bf16.mxu1 %v1212_v12  ;;  %v1219_v24 = vld [vmem:[%s1463_s0 + $0x24] ss:$8 sps:$4 sm:$0xff]   ;;  %v1223_v26 = vld [vmem:[%s1463_s0 + $0x20] ss:$8 sps:$4 sm:$0xff]   ;;  %v1225_v28 = vld [vmem:[%s1463_s0 + $0x34] ss:$8 sps:$4 sm:$0xff]  }
   0xa   :  { %v1221_v25 = vld [vmem:[%s1463_s0 + $0xa4] ss:$8 sps:$4 sm:$0xff]   ;;  %v1224_v27 = vld [vmem:[%s1463_s0 + $0xa0] ss:$8 sps:$4 sm:$0xff]   ;;  %v1227_v29 = vld [vmem:[%s1463_s0 + $0xb4] ss:$8 sps:$4 sm:$0xff]  }
   0xb   :  { %1068 = vmatpush3.bf16.msra.mxu0 %v1196_v5  ;;  %1185 = vmatpush3.bf16.msra.mxu1 %v1196_v5  ;;  %v1229_v30 = vld [vmem:[%s1463_s0 + $0x30] ss:$8 sps:$4 sm:$0xff]   ;;  %v1231_v32 = vld [vmem:[%s1463_s0 + $0x44] ss:$8 sps:$4 sm:$0xff]   ;;  %v1235_v34 = vld [vmem:[%s1463_s0 + $0x40] ss:$8 sps:$4 sm:$0xff]  }
   0xc   :  { %1069 = vmatprep.subr.bf16.mxu0 %v1197_v6  ;;  %1178 = vmatprep.subr.bf16.mxu1 %v1197_v6  ;;  %v1230_v31 = vld [vmem:[%s1463_s0 + $0xb0] ss:$8 sps:$4 sm:$0xff]   ;;  %v1233_v33 = vld [vmem:[%s1463_s0 + $0xc4] ss:$8 sps:$4 sm:$0xff]   ;;  %v1236_v35 = vld [vmem:[%s1463_s0 + $0xc0] ss:$8 sps:$4 sm:$0xff]  }
   0xd   :  { %v1237_v36 = vld [vmem:[%s1463_s0 + $0x54] ss:$8 sps:$4 sm:$0xff]   ;;  %v1241_v38 = vld [vmem:[%s1463_s0 + $0x50] ss:$8 sps:$4 sm:$0xff]   ;;  %v1243_v40 = vld [vmem:[%s1463_s0 + $0x64] ss:$8 sps:$4 sm:$0xff]  }
   0xe   :  { %v1239_v37 = vld [vmem:[%s1463_s0 + $0xd4] ss:$8 sps:$4 sm:$0xff]   ;;  %v1242_v39 = vld [vmem:[%s1463_s0 + $0xd0] ss:$8 sps:$4 sm:$0xff]   ;;  %v1245_v41 = vld [vmem:[%s1463_s0 + $0xe4] ss:$8 sps:$4 sm:$0xff]  }
   0xf   :  { %1070 = vmatpush3.bf16.msra.mxu0 %v1198_v7  ;;  %1186 = vmatpush3.bf16.msra.mxu1 %v1198_v7  ;;  %v1247_v42 = vld [vmem:[%s1463_s0 + $0x60] ss:$8 sps:$4 sm:$0xff]   ;;  %v1249_v44 = vld [vmem:[%s1463_s0 + $0x74] ss:$8 sps:$4 sm:$0xff]   ;;  %v1253_v46 = vld [vmem:[%s1463_s0 + $0x70] ss:$8 sps:$4 sm:$0xff]  }
  0x10   :  { %1071 = vmatprep.subr.bf16.mxu0 %v1199_v8  ;;  %1179 = vmatprep.subr.bf16.mxu1 %v1199_v8  ;;  %v1248_v43 = vld [vmem:[%s1463_s0 + $0xe0] ss:$8 sps:$4 sm:$0xff]   ;;  %v1251_v45 = vld [vmem:[%s1463_s0 + $0xf4] ss:$8 sps:$4 sm:$0xff]   ;;  %v1254_v47 = vld [vmem:[%s1463_s0 + $0xf0] ss:$8 sps:$4 sm:$0xff]  }
  0x13   :  { %1072 = vmatpush3.bf16.msra.mxu0 %v1200_v9  ;;  %1187 = vmatpush3.bf16.msra.mxu1 %v1200_v9 }
  0x14   :  { %1073 = vmatprep.subr.bf16.mxu0 %v1201_v10  ;;  %1180 = vmatprep.subr.bf16.mxu1 %v1201_v10 }
  0x17   :  { %1074 = vmatpush3.bf16.msra.mxu0 %v1202_v13  ;;  %1188 = vmatpush3.bf16.msra.mxu1 %v1202_v13 }
  0x18   :  { %1075 = vmatprep.subr.bf16.mxu0 %v1203_v14  ;;  %1181 = vmatprep.subr.bf16.mxu1 %v1203_v14 }
  0x1b   :  { %1076 = vmatpush3.bf16.msra.mxu0 %v1204_v15  ;;  %1189 = vmatpush3.bf16.msra.mxu1 %v1204_v15 }
  0x1c   :  { %1077 = vmatprep.subr.bf16.mxu0 %v1205_v16  ;;  %1182 = vmatprep.subr.bf16.mxu1 %v1205_v16 }
  0x1f   :  { %1078 = vmatpush3.bf16.msra.mxu0 %v1206_v17  ;;  %1190 = vmatpush3.bf16.msra.mxu1 %v1206_v17 }
  0x22   :  { %433 = vmatmul.mubr.bf16.vlgmr.msra.gmra.mrb[0].mxu0 %v1207_v18  ;;  %497 = vmatmul.mubr.bf16.vlgmr.msra.gmra.mrb[0].mxu1 %v1210_v19 }
  0x23   :  { %440 = vmatprep.mubr.bf16.mxu0 %v1213_v20  ;;  %504 = vmatprep.mubr.bf16.mxu1 %v1215_v21 }
  0x2a   :  { %441 = vmatmul.mubr.bf16.gmra.mrb[4].mxu0 %v1217_v22  ;;  %505 = vmatmul.mubr.bf16.gmra.mrb[4].mxu1 %v1218_v23 }
  0x2b   :  { %448 = vmatprep.mubr.bf16.mxu0 %v1219_v24  ;;  %512 = vmatprep.mubr.bf16.mxu1 %v1221_v25 }
  0x32   :  { %449 = vmatmul.mubr.bf16.gmra.mrb[8].mxu0 %v1223_v26  ;;  %513 = vmatmul.mubr.bf16.gmra.mrb[8].mxu1 %v1224_v27 }
  0x33   :  { %456 = vmatprep.mubr.bf16.mxu0 %v1225_v28  ;;  %520 = vmatprep.mubr.bf16.mxu1 %v1227_v29 }
  0x3a   :  { %457 = vmatmul.mubr.bf16.gmra.mrb[12].mxu0 %v1229_v30  ;;  %521 = vmatmul.mubr.bf16.gmra.mrb[12].mxu1 %v1230_v31 }
  0x3b   :  { %464 = vmatprep.mubr.bf16.mxu0 %v1231_v32  ;;  %528 = vmatprep.mubr.bf16.mxu1 %v1233_v33 }
  0x42   :  { %465 = vmatmul.mubr.bf16.gmra.mrb[16].mxu0 %v1235_v34  ;;  %529 = vmatmul.mubr.bf16.gmra.mrb[16].mxu1 %v1236_v35 }
  0x43   :  { %472 = vmatprep.mubr.bf16.mxu0 %v1237_v36  ;;  %536 = vmatprep.mubr.bf16.mxu1 %v1239_v37 }
  0x4a   :  { %473 = vmatmul.mubr.bf16.gmra.mrb[20].mxu0 %v1241_v38  ;;  %537 = vmatmul.mubr.bf16.gmra.mrb[20].mxu1 %v1242_v39 }
  0x4b   :  { %480 = vmatprep.mubr.bf16.mxu0 %v1243_v40  ;;  %544 = vmatprep.mubr.bf16.mxu1 %v1245_v41 }
  0x52   :  { %481 = vmatmul.mubr.bf16.gmra.mrb[24].mxu0 %v1247_v42  ;;  %545 = vmatmul.mubr.bf16.gmra.mrb[24].mxu1 %v1248_v43 }
  0x53   :  { %488 = vmatprep.mubr.bf16.mxu0 %v1249_v44  ;;  %552 = vmatprep.mubr.bf16.mxu1 %v1251_v45 }
  0x5a   :  { %489 = vmatmul.mubr.bf16.gmra.mrb[28].mxu0 %v1253_v46  ;;  %553 = vmatmul.mubr.bf16.gmra.mrb[28].mxu1 %v1254_v47 }
  0xf5   :  { %v1079_v48 = vpop.f32.mrb[0].mxu0  ;;  %v1127_v49 = vpop.f32.mrb[0].mxu1 }
  0xf6   :  { %v1080_v50 = vpop.f32.mrb[1].mxu0  ;;  %v1128_v51 = vpop.f32.mrb[1].mxu1 }
  0xf7   :  { %v1081_v52 = vadd.f32 %v1080_v50, %v1079_v48  ;;  %v1129_v53 = vadd.f32 %v1128_v51, %v1127_v49  ;;  %v1082_v54 = vpop.f32.mrb[2].mxu0  ;;  %v1130_v55 = vpop.f32.mrb[2].mxu1 }
  0xf8   :  { %v1083_v56 = vpop.f32.mrb[3].mxu0  ;;  %v1131_v57 = vpop.f32.mrb[3].mxu1 }
  0xf9   :  { %v1084_v58 = vadd.f32 %v1083_v56, %v1082_v54  ;;  %v1132_v59 = vadd.f32 %v1131_v57, %v1130_v55  ;;  %v660_v60 = vmax.f32 %v1081_v52, 0.0  ;;  %v676_v61 = vmax.f32 %v1129_v53, 0.0 }
  0xfb   :  { %v661_v62 = vmax.f32 %v1084_v58, 0.0  ;;  %v677_v63 = vmax.f32 %v1132_v59, 0.0 }
  0xfd   :  { %v971_v0 = vpack.c.bf16 %v661_v62, %v660_v60  ;;  %v1011_v1 = vpack.c.bf16 %v677_v63, %v676_v61  ;;  %v1085_v2 = vpop.f32.mrb[4].mxu0  ;;  %v1133_v3 = vpop.f32.mrb[4].mxu1 }
  0xfe   :  { %v1086_v4 = vpop.f32.mrb[5].mxu0  ;;  %v1134_v5 = vpop.f32.mrb[5].mxu1 }
  0xff   :  { %972 = vst [vmem:[%s1464_s2] sm:$0xff] %v971_v0   ;;  %1055 = vst [vmem:[%s1464_s2 + $0x40] sm:$0xff] %v1011_v1   ;;  %v1087_v6 = vadd.f32 %v1086_v4, %v1085_v2  ;;  %v1135_v7 = vadd.f32 %v1134_v5, %v1133_v3  ;;  %v1088_v8 = vpop.f32.mrb[6].mxu0  ;;  %v1136_v9 = vpop.f32.mrb[6].mxu1 }
 0x100   :  { %v1089_v10 = vpop.f32.mrb[7].mxu0  ;;  %v1137_v11 = vpop.f32.mrb[7].mxu1 }
 0x101   :  { %v1090_v12 = vadd.f32 %v1089_v10, %v1088_v8  ;;  %v1138_v13 = vadd.f32 %v1137_v11, %v1136_v9  ;;  %v662_v14 = vmax.f32 %v1087_v6, 0.0  ;;  %v678_v15 = vmax.f32 %v1135_v7, 0.0 }
 0x103   :  { %v663_v16 = vmax.f32 %v1090_v12, 0.0  ;;  %v679_v17 = vmax.f32 %v1138_v13, 0.0 }
 0x105   :  { %v976_v18 = vpack.c.bf16 %v663_v16, %v662_v14  ;;  %v1016_v19 = vpack.c.bf16 %v679_v17, %v678_v15  ;;  %v1091_v20 = vpop.f32.mrb[8].mxu0  ;;  %v1139_v21 = vpop.f32.mrb[8].mxu1 }
 0x106   :  { %v1092_v22 = vpop.f32.mrb[9].mxu0  ;;  %v1140_v23 = vpop.f32.mrb[9].mxu1 }
 0x107   :  { %1048 = vst [vmem:[%s1464_s2 + $0x8] sm:$0xff] %v976_v18   ;;  %1056 = vst [vmem:[%s1464_s2 + $0x48] sm:$0xff] %v1016_v19   ;;  %v1093_v24 = vadd.f32 %v1092_v22, %v1091_v20  ;;  %v1141_v25 = vadd.f32 %v1140_v23, %v1139_v21  ;;  %v1094_v26 = vpop.f32.mrb[10].mxu0  ;;  %v1142_v27 = vpop.f32.mrb[10].mxu1 }
 0x108   :  { %v1095_v28 = vpop.f32.mrb[11].mxu0  ;;  %v1143_v29 = vpop.f32.mrb[11].mxu1 }
 0x109   :  { %v1096_v30 = vadd.f32 %v1095_v28, %v1094_v26  ;;  %v1144_v31 = vadd.f32 %v1143_v29, %v1142_v27  ;;  %v664_v32 = vmax.f32 %v1093_v24, 0.0  ;;  %v680_v33 = vmax.f32 %v1141_v25, 0.0 }
 0x10b   :  { %v665_v34 = vmax.f32 %v1096_v30, 0.0  ;;  %v681_v35 = vmax.f32 %v1144_v31, 0.0 }
 0x10d   :  { %v981_v36 = vpack.c.bf16 %v665_v34, %v664_v32  ;;  %v1021_v37 = vpack.c.bf16 %v681_v35, %v680_v33  ;;  %v1097_v38 = vpop.f32.mrb[12].mxu0  ;;  %v1145_v39 = vpop.f32.mrb[12].mxu1 }
 0x10e   :  { %v1098_v40 = vpop.f32.mrb[13].mxu0  ;;  %v1146_v41 = vpop.f32.mrb[13].mxu1 }
 0x10f   :  { %1049 = vst [vmem:[%s1464_s2 + $0x10] sm:$0xff] %v981_v36   ;;  %1057 = vst [vmem:[%s1464_s2 + $0x50] sm:$0xff] %v1021_v37   ;;  %v1099_v42 = vadd.f32 %v1098_v40, %v1097_v38  ;;  %v1147_v43 = vadd.f32 %v1146_v41, %v1145_v39  ;;  %v1100_v44 = vpop.f32.mrb[14].mxu0  ;;  %v1148_v45 = vpop.f32.mrb[14].mxu1 }
 0x110   :  { %v1101_v46 = vpop.f32.mrb[15].mxu0  ;;  %v1149_v47 = vpop.f32.mrb[15].mxu1 }
 0x111   :  { %v1102_v48 = vadd.f32 %v1101_v46, %v1100_v44  ;;  %v1150_v49 = vadd.f32 %v1149_v47, %v1148_v45  ;;  %v666_v50 = vmax.f32 %v1099_v42, 0.0  ;;  %v682_v51 = vmax.f32 %v1147_v43, 0.0 }
 0x113   :  { %v667_v52 = vmax.f32 %v1102_v48, 0.0  ;;  %v683_v53 = vmax.f32 %v1150_v49, 0.0 }
 0x115   :  { %v986_v54 = vpack.c.bf16 %v667_v52, %v666_v50  ;;  %v1026_v55 = vpack.c.bf16 %v683_v53, %v682_v51  ;;  %v1103_v56 = vpop.f32.mrb[16].mxu0  ;;  %v1151_v57 = vpop.f32.mrb[16].mxu1 }
 0x116   :  { %v1104_v58 = vpop.f32.mrb[17].mxu0  ;;  %v1152_v59 = vpop.f32.mrb[17].mxu1 }
 0x117   :  { %1050 = vst [vmem:[%s1464_s2 + $0x18] sm:$0xff] %v986_v54   ;;  %1058 = vst [vmem:[%s1464_s2 + $0x58] sm:$0xff] %v1026_v55   ;;  %v1105_v60 = vadd.f32 %v1104_v58, %v1103_v56  ;;  %v1153_v61 = vadd.f32 %v1152_v59, %v1151_v57  ;;  %v1106_v62 = vpop.f32.mrb[18].mxu0  ;;  %v1154_v63 = vpop.f32.mrb[18].mxu1 }
 0x118   :  { %v1107_v0 = vpop.f32.mrb[19].mxu0  ;;  %v1155_v1 = vpop.f32.mrb[19].mxu1 }
 0x119   :  { %v1108_v2 = vadd.f32 %v1107_v0, %v1106_v62  ;;  %v1156_v3 = vadd.f32 %v1155_v1, %v1154_v63  ;;  %v668_v4 = vmax.f32 %v1105_v60, 0.0  ;;  %v684_v5 = vmax.f32 %v1153_v61, 0.0 }
 0x11b   :  { %v669_v6 = vmax.f32 %v1108_v2, 0.0  ;;  %v685_v7 = vmax.f32 %v1156_v3, 0.0 }
 0x11d   :  { %v991_v8 = vpack.c.bf16 %v669_v6, %v668_v4  ;;  %v1031_v9 = vpack.c.bf16 %v685_v7, %v684_v5  ;;  %v1109_v10 = vpop.f32.mrb[20].mxu0  ;;  %v1157_v11 = vpop.f32.mrb[20].mxu1 }
 0x11e   :  { %v1110_v12 = vpop.f32.mrb[21].mxu0  ;;  %v1158_v13 = vpop.f32.mrb[21].mxu1 }
 0x11f   :  { %1051 = vst [vmem:[%s1464_s2 + $0x20] sm:$0xff] %v991_v8   ;;  %1059 = vst [vmem:[%s1464_s2 + $0x60] sm:$0xff] %v1031_v9   ;;  %v1111_v14 = vadd.f32 %v1110_v12, %v1109_v10  ;;  %v1159_v15 = vadd.f32 %v1158_v13, %v1157_v11  ;;  %v1112_v16 = vpop.f32.mrb[22].mxu0  ;;  %v1160_v17 = vpop.f32.mrb[22].mxu1 }
 0x120   :  { %v1113_v18 = vpop.f32.mrb[23].mxu0  ;;  %v1161_v19 = vpop.f32.mrb[23].mxu1 }
 0x121   :  { %v1114_v20 = vadd.f32 %v1113_v18, %v1112_v16  ;;  %v1162_v21 = vadd.f32 %v1161_v19, %v1160_v17  ;;  %v670_v22 = vmax.f32 %v1111_v14, 0.0  ;;  %v686_v23 = vmax.f32 %v1159_v15, 0.0 }
 0x123   :  { %v671_v24 = vmax.f32 %v1114_v20, 0.0  ;;  %v687_v25 = vmax.f32 %v1162_v21, 0.0 }
 0x125   :  { %v996_v26 = vpack.c.bf16 %v671_v24, %v670_v22  ;;  %v1036_v27 = vpack.c.bf16 %v687_v25, %v686_v23  ;;  %v1115_v28 = vpop.f32.mrb[24].mxu0  ;;  %v1163_v29 = vpop.f32.mrb[24].mxu1 }
 0x126   :  { %v1116_v30 = vpop.f32.mrb[25].mxu0  ;;  %v1164_v31 = vpop.f32.mrb[25].mxu1 }
 0x127   :  { %1052 = vst [vmem:[%s1464_s2 + $0x28] sm:$0xff] %v996_v26   ;;  %1060 = vst [vmem:[%s1464_s2 + $0x68] sm:$0xff] %v1036_v27   ;;  %v1117_v32 = vadd.f32 %v1116_v30, %v1115_v28  ;;  %v1165_v33 = vadd.f32 %v1164_v31, %v1163_v29  ;;  %v1118_v34 = vpop.f32.mrb[26].mxu0  ;;  %v1166_v35 = vpop.f32.mrb[26].mxu1 }
 0x128   :  { %v1119_v36 = vpop.f32.mrb[27].mxu0  ;;  %v1167_v37 = vpop.f32.mrb[27].mxu1 }
 0x129   :  { %v1120_v38 = vadd.f32 %v1119_v36, %v1118_v34  ;;  %v1168_v39 = vadd.f32 %v1167_v37, %v1166_v35  ;;  %v672_v40 = vmax.f32 %v1117_v32, 0.0  ;;  %v688_v41 = vmax.f32 %v1165_v33, 0.0 }
 0x12b   :  { %v673_v42 = vmax.f32 %v1120_v38, 0.0  ;;  %v689_v43 = vmax.f32 %v1168_v39, 0.0 }
 0x12d   :  { %v1001_v44 = vpack.c.bf16 %v673_v42, %v672_v40  ;;  %v1041_v45 = vpack.c.bf16 %v689_v43, %v688_v41  ;;  %v1121_v46 = vpop.f32.mrb[28].mxu0  ;;  %v1169_v47 = vpop.f32.mrb[28].mxu1 }
 0x12e   :  { %v1122_v48 = vpop.f32.mrb[29].mxu0  ;;  %v1170_v49 = vpop.f32.mrb[29].mxu1 }
 0x12f   :  { %1053 = vst [vmem:[%s1464_s2 + $0x30] sm:$0xff] %v1001_v44   ;;  %1061 = vst [vmem:[%s1464_s2 + $0x70] sm:$0xff] %v1041_v45   ;;  %v1123_v50 = vadd.f32 %v1122_v48, %v1121_v46  ;;  %v1171_v51 = vadd.f32 %v1170_v49, %v1169_v47  ;;  %v1124_v52 = vpop.f32.mrb[30].mxu0  ;;  %v1172_v53 = vpop.f32.mrb[30].mxu1 }
 0x130   :  { %v1125_v54 = vpop.f32.mrb[31].mxu0  ;;  %v1173_v55 = vpop.f32.mrb[31].mxu1 }
 0x131   :  { %v1126_v56 = vadd.f32 %v1125_v54, %v1124_v52  ;;  %v1174_v57 = vadd.f32 %v1173_v55, %v1172_v53  ;;  %v674_v58 = vmax.f32 %v1123_v50, 0.0  ;;  %v690_v59 = vmax.f32 %v1171_v51, 0.0 }
 0x133   :  { %v675_v60 = vmax.f32 %v1126_v56, 0.0  ;;  %v691_v61 = vmax.f32 %v1174_v57, 0.0 }
 0x135   :  { %v1006_v62 = vpack.c.bf16 %v675_v60, %v674_v58  ;;  %v1046_v63 = vpack.c.bf16 %v691_v61, %v690_v59 }
 0x137   :  { %1054 = vst [vmem:[%s1464_s2 + $0x38] sm:$0xff] %v1006_v62   ;;  %1062 = vst [vmem:[%s1464_s2 + $0x78] sm:$0xff] %v1046_v63  }

// kernel: graphfull_train_forward.9
= control target key start
LH: loop header
LB: loop body
LE: loop exit
PB: predicated region body
PF: predicated region fallthrough
CT: control target
= control target key end

     0   :  { %14 = vsyncpa [#allocation3], 0  ;;  %v651_v3 = vmov 0.0|0.0   ;;  %vm652_vm0 = vmmov 0   ;;  %v653_v6 = vmov 0.0   ;;  %s909_s0 = inlined_call_operand.vmem [shape: f32[8,128], index: 0, kind: input, shape index: {}]   ;;  %s910_s1 = inlined_call_operand.vmem [shape: f32[128,128], index: 1, kind: input, shape index: {}]   ;;  %s911_s2 = inlined_call_operand.vmem [shape: f32[1,128], index: 2, kind: input, shape index: {}]   ;;  %s912_s3 = inlined_call_operand.vmem [shape: f32[128,128], index: 3, kind: input, shape index: {}]   ;;  %s913_s4 = inlined_call_operand.vmem [shape: f32[1,128], index: 4, kind: input, shape index: {}]   ;;  %s914_s5 = inlined_call_operand.vmem [shape: f32[128,128], index: 5, kind: input, shape index: {}]   ;;  %s915_s6 = inlined_call_operand.vmem [shape: s32[8,1], index: 6, kind: input, shape index: {}]   ;;  %s916_s7 = inlined_call_operand.hbm [shape: f32[8,128], index: 7, kind: output, shape index: {0}]   ;;  %s917_s8 = inlined_call_operand.hbm [shape: f32[1,1], index: 8, kind: output, shape index: {1}]  }
   0x1   :  { %v31_v0 = vld [vmem:[%s910_s1] sm:$0xff]  ;;  %v32_v1 = vld [vmem:[%s910_s1 + $0x8] sm:$0xff]  ;;  %v33_v2 = vld [vmem:[%s910_s1 + $0x10] sm:$0xff]  ;;  %530 = vmatprep.subr.bf16.mxu1 %v651_v3  ;;  %457 = vmatprep.mubr.msk.f32.mxu1 %vm652_vm0, %v653_v6 }
   0x2   :  { %v531_v4 = vpack.c.bf16 %v32_v1, %v31_v0  ;;  %v34_v5 = vld [vmem:[%s910_s1 + $0x18] sm:$0xff]  ;;  %578 = vmatprep.subr.bf16.mxu0 %v651_v3  ;;  %527 = vmatprep.mubr.msk.f32.mxu0 %vm652_vm0, %v653_v6  ;;  %v35_v8 = vld [vmem:[%s910_s1 + $0x20] sm:$0xff]  ;;  %v36_v9 = vld [vmem:[%s910_s1 + $0x28] sm:$0xff] }
   0x3   :  { %v534_v7 = vpack.c.bf16 %v34_v5, %v33_v2  ;;  %v537_v10 = vpack.c.bf16 %v36_v9, %v35_v8  ;;  %v37_v11 = vld [vmem:[%s910_s1 + $0x30] sm:$0xff]  ;;  %v38_v12 = vld [vmem:[%s910_s1 + $0x38] sm:$0xff] }
   0x4   :  { %532 = vmatpush3.bf16.msra.mxu1 %v531_v4 }
   0x5   :  { %533 = vmatprep.subr.bf16.mxu1 %v651_v3 }
   0x8   :  { %535 = vmatpush3.bf16.msra.mxu1 %v534_v7 }
   0x9   :  { %536 = vmatprep.subr.bf16.mxu1 %v651_v3 }
   0xa   :  { %15 = vsyncpa [#allocation4], 0  ;;  %v540_v13 = vpack.c.bf16 %v38_v12, %v37_v11  ;;  %v39_v14 = vld [vmem:[%s910_s1 + $0x40] sm:$0xff]  ;;  %v40_v15 = vld [vmem:[%s910_s1 + $0x48] sm:$0xff]  ;;  %vm329_vm3 = vcmask 7168  }
   0xb   :  { %v543_v16 = vpack.c.bf16 %v40_v15, %v39_v14  ;;  %v41_v17 = vld [vmem:[%s910_s1 + $0x50] sm:$0xff]  ;;  %v42_v18 = vld [vmem:[%s910_s1 + $0x58] sm:$0xff]  ;;  %v43_v20 = vld [vmem:[%s910_s1 + $0x60] sm:$0xff] }
   0xc   :  { %538 = vmatpush3.bf16.msra.mxu1 %v537_v10  ;;  %v546_v19 = vpack.c.bf16 %v42_v18, %v41_v17  ;;  %v44_v21 = vld [vmem:[%s910_s1 + $0x68] sm:$0xff]  ;;  %v45_v23 = vld [vmem:[%s910_s1 + $0x70] sm:$0xff]  ;;  %v46_v24 = vld [vmem:[%s910_s1 + $0x78] sm:$0xff] }
   0xd   :  { %539 = vmatprep.subr.bf16.mxu1 %v651_v3  ;;  %v549_v22 = vpack.c.bf16 %v44_v21, %v43_v20  ;;  %v552_v25 = vpack.c.bf16 %v46_v24, %v45_v23  ;;  %v125_v26 = vld [vmem:[%s912_s3] sm:$0xff]  ;;  %v126_v27 = vld [vmem:[%s912_s3 + $0x8] sm:$0xff]  ;;  %v127_v30 = vld [vmem:[%s912_s3 + $0x10] sm:$0xff]  ;;  %v654_v21 = vmov 0  }
   0xe   :  { %v30_v28 = vld [vmem:[%s909_s0] sm:$0xff]  ;;  %v555_v29 = vpack.c.bf16 %v126_v27, %v125_v26  ;;  %v128_v31 = vld [vmem:[%s912_s3 + $0x18] sm:$0xff]  ;;  %v130_v34 = vld [vmem:[%s912_s3 + $0x28] sm:$0xff]  ;;  %610 = vset.pattern.permute.xlu0 %v654_v21 }
   0xf   :  { %v558_v32 = vpack.c.bf16 %v128_v31, %v127_v30  ;;  %v129_v33 = vld [vmem:[%s912_s3 + $0x20] sm:$0xff]  ;;  %v131_v36 = vld [vmem:[%s912_s3 + $0x30] sm:$0xff]  ;;  %v132_v37 = vld [vmem:[%s912_s3 + $0x38] sm:$0xff] }
  0x10   :  { %541 = vmatpush3.bf16.msra.mxu1 %v540_v13  ;;  %v561_v35 = vpack.c.bf16 %v130_v34, %v129_v33  ;;  %v564_v38 = vpack.c.bf16 %v132_v37, %v131_v36  ;;  %v133_v39 = vld [vmem:[%s912_s3 + $0x40] sm:$0xff]  ;;  %v134_v40 = vld [vmem:[%s912_s3 + $0x48] sm:$0xff]  ;;  %v135_v42 = vld [vmem:[%s912_s3 + $0x50] sm:$0xff] }
  0x11   :  { %542 = vmatprep.subr.bf16.mxu1 %v651_v3  ;;  %v567_v41 = vpack.c.bf16 %v134_v40, %v133_v39  ;;  %v136_v43 = vld [vmem:[%s912_s3 + $0x58] sm:$0xff]  ;;  %v137_v45 = vld [vmem:[%s912_s3 + $0x60] sm:$0xff]  ;;  %v138_v46 = vld [vmem:[%s912_s3 + $0x68] sm:$0xff] }
  0x12   :  { %v570_v44 = vpack.c.bf16 %v136_v43, %v135_v42  ;;  %v573_v47 = vpack.c.bf16 %v138_v46, %v137_v45  ;;  %v139_v48 = vld [vmem:[%s912_s3 + $0x70] sm:$0xff]  ;;  %v140_v49 = vld [vmem:[%s912_s3 + $0x78] sm:$0xff]  ;;  %v219_v51 = vld [vmem:[%s914_s5] sm:$0xff] }
  0x13   :  { %v576_v50 = vpack.c.bf16 %v140_v49, %v139_v48  ;;  %v220_v52 = vld [vmem:[%s914_s5 + $0x8] sm:$0xff]  ;;  %v221_v54 = vld [vmem:[%s914_s5 + $0x10] sm:$0xff]  ;;  %v222_v55 = vld [vmem:[%s914_s5 + $0x18] sm:$0xff] }
  0x14   :  { %544 = vmatpush3.bf16.msra.mxu1 %v543_v16  ;;  %v579_v53 = vpack.c.bf16 %v220_v52, %v219_v51  ;;  %v582_v56 = vpack.c.bf16 %v222_v55, %v221_v54  ;;  %v223_v57 = vld [vmem:[%s914_s5 + $0x20] sm:$0xff]  ;;  %v224_v58 = vld [vmem:[%s914_s5 + $0x28] sm:$0xff]  ;;  %v225_v60 = vld [vmem:[%s914_s5 + $0x30] sm:$0xff] }
  0x15   :  { %545 = vmatprep.subr.bf16.mxu1 %v651_v3  ;;  %v585_v59 = vpack.c.bf16 %v224_v58, %v223_v57  ;;  %v226_v61 = vld [vmem:[%s914_s5 + $0x38] sm:$0xff]  ;;  %v227_v63 = vld [vmem:[%s914_s5 + $0x40] sm:$0xff]  ;;  %v228_v0 = vld [vmem:[%s914_s5 + $0x48] sm:$0xff] }
  0x16   :  { %580 = vmatpush3.bf16.xpose.msra.mxu0 %v579_v53  ;;  %v588_v62 = vpack.c.bf16 %v226_v61, %v225_v60  ;;  %v591_v1 = vpack.c.bf16 %v228_v0, %v227_v63  ;;  %v229_v2 = vld [vmem:[%s914_s5 + $0x50] sm:$0xff]  ;;  %v230_v4 = vld [vmem:[%s914_s5 + $0x58] sm:$0xff]  ;;  %v232_v7 = vld [vmem:[%s914_s5 + $0x68] sm:$0xff] }
  0x17   :  { %581 = vmatprep.subr.bf16.mxu0 %v651_v3  ;;  %v594_v5 = vpack.c.bf16 %v230_v4, %v229_v2  ;;  %v233_v9 = vld [vmem:[%s914_s5 + $0x70] sm:$0xff]  ;;  %v234_v10 = vld [vmem:[%s914_s5 + $0x78] sm:$0xff]  ;;  %v372_v12 = vld [vmem:[%s911_s2] ss:$0 sm:$0xff] }
  0x18   :  { %547 = vmatpush3.bf16.msra.mxu1 %v546_v19  ;;  %v600_v11 = vpack.c.bf16 %v234_v10, %v233_v9  ;;  %v320_v27 = vld [vmem:[%s915_s6] sm:$0xff] }
  0x19   :  { %548 = vmatprep.subr.bf16.mxu1 %v651_v3 }
  0x1c   :  { %550 = vmatpush3.bf16.msra.mxu1 %v549_v22  ;;  %v305_v22 = vlaneseq }
  0x1d   :  { %551 = vmatprep.subr.bf16.mxu1 %v651_v3 }
  0x1e   :  { %583 = vmatpush3.bf16.xpose.msra.mxu0 %v582_v56  ;;  %v306_v23 = vand.u32 127, %v305_v22 }
  0x1f   :  { %584 = vmatprep.subr.bf16.mxu0 %v651_v3 }
  0x20   :  { %553 = vmatpush3.bf16.msra.mxu1 %v552_v25  ;;  %vm307_vm1 = vcmp.lt.s32.totalorder %v306_v23, 24 }
  0x21   :  { %554 = vmatprep.subr.bf16.mxu1 %v651_v3 }
  0x23   :  { %458 = vmatmul.mubr.f32.vlgmr.msra.gmra.mrb[0].mxu1 %v30_v28 }
  0x24   :  { %556 = vmatpush3.bf16.msra.mxu1 %v555_v29  ;;  %492 = vmatprep.mubr.msk.f32.mxu1 %vm652_vm0, %v653_v6  ;;  %v231_v6 = vld [vmem:[%s914_s5 + $0x60] sm:$0xff] }
  0x25   :  { %557 = vmatprep.subr.bf16.mxu1 %v651_v3  ;;  %v597_v8 = vpack.c.bf16 %v232_v7, %v231_v6 }
  0x26   :  { %586 = vmatpush3.bf16.xpose.msra.mxu0 %v585_v59 }
  0x27   :  { %587 = vmatprep.subr.bf16.mxu0 %v651_v3 }
  0x28   :  { %559 = vmatpush3.bf16.msra.mxu1 %v558_v32 }
  0x29   :  { %560 = vmatprep.subr.bf16.mxu1 %v651_v3 }
  0x2c   :  { %562 = vmatpush3.bf16.msra.mxu1 %v561_v35 }
  0x2d   :  { %563 = vmatprep.subr.bf16.mxu1 %v651_v3 }
  0x2e   :  { %589 = vmatpush3.bf16.xpose.msra.mxu0 %v588_v62 }
  0x2f   :  { %590 = vmatprep.subr.bf16.mxu0 %v651_v3 }
  0x30   :  { %565 = vmatpush3.bf16.msra.mxu1 %v564_v38 }
  0x31   :  { %566 = vmatprep.subr.bf16.mxu1 %v651_v3 }
  0x34   :  { %568 = vmatpush3.bf16.msra.mxu1 %v567_v41 }
  0x35   :  { %569 = vmatprep.subr.bf16.mxu1 %v651_v3 }
  0x36   :  { %592 = vmatpush3.bf16.xpose.msra.mxu0 %v591_v1 }
  0x37   :  { %593 = vmatprep.subr.bf16.mxu0 %v651_v3 }
  0x38   :  { %571 = vmatpush3.bf16.msra.mxu1 %v570_v44 }
  0x39   :  { %572 = vmatprep.subr.bf16.mxu1 %v651_v3 }
  0x3c   :  { %574 = vmatpush3.bf16.msra.mxu1 %v573_v47 }
  0x3d   :  { %575 = vmatprep.subr.bf16.mxu1 %v651_v3 }
  0x3e   :  { %595 = vmatpush3.bf16.xpose.msra.mxu0 %v594_v5 }
  0x3f   :  { %596 = vmatprep.subr.bf16.mxu0 %v651_v3 }
  0x40   :  { %577 = vmatpush3.bf16.msra.mxu1 %v576_v50 }
  0x46   :  { %598 = vmatpush3.bf16.xpose.msra.mxu0 %v597_v8 }
  0x47   :  { %599 = vmatprep.subr.bf16.mxu0 %v651_v3  ;;  %v373_v3 = vld [vmem:[%s913_s4] ss:$0 sm:$0xff]  ;;  %s655_s4 = smov [#allocation2]  }
  0x48   :  { %s351_s6 = sshll.u32 %s655_s4, 4  ;;  %s352_s6 = int_to_ptr.vmem [resolvable:$true] %s351_s6 }
  0x49   :  { %s615_s11 = scalar_lea.vmem %s352_s6, 128  ;;  %p620_p1 = scmp.lt.s32.totalorder %s352_s6, %s352_s6 }
  0x4a   :  { %p616_p0 = scmp.ne.s32.totalorder %s352_s6, %s615_s11  ;;  %p621_p2 = scmp.lt.s32.totalorder %s615_s11, %s615_s11 }
  0x4c   :  { %p622_p3 = por %p621_p2, %p620_p1 }
  0x4e   :  { %601 = vmatpush3.bf16.xpose.msra.mxu0 %v600_v11  ;;  %p623_p4 = pnand %p622_p3, %p616_p0 }
  0xf6   :  { %v120_v13 = vpop.f32.mrb[0].mxu1 }
  0xf7   :  { %v121_v14 = vadd.f32 %v372_v12, %v120_v13  ;;  %v459_v15 = vpop.f32.mrb[1].mxu1 }
  0xf9   :  { %v124_v16 = vmax.f32 %v121_v14, 0.0 }
  0xfb   :  { %493 = vmatmul.mubr.f32.vlgmr.msra.gmra.mrb[2].mxu1 %v124_v16 }
 0x1ce   :  { %v214_v17 = vpop.f32.mrb[2].mxu1 }
 0x1cf   :  { %v215_v18 = vadd.f32 %v373_v3, %v214_v17  ;;  %v494_v19 = vpop.f32.mrb[3].mxu1 }
 0x1d1   :  { %v218_v20 = vmax.f32 %v215_v18, 0.0 }
 0x1d3   :  { %528 = vmatmul.mubr.f32.vlgmr.msra.gmra.mrb[0].mxu0 %v218_v20 }
 0x2a6   :  { %v301_v24 = vpop.f32.mrb[0].mxu0 }
 0x2a7   :  { %v308_v25 = vsel %vm307_vm1, %v301_v24, -1e+30  ;;  %v529_v26 = vpop.f32.mrb[1].mxu0 }
 0x2a8   :  { %309 = vst [vmem:[#allocation2] sm:$0xff] %v308_v25  ;;  %310 = vmax.xlane.f32.xlu0 %v308_v25 }
 0x2be   :  { %322 = vperm.xlu0 %610, %v320_v27  }
 0x335   :  { %v311_v28 = vpop.xlane.xlu0 %310 }
 0x336   :  { %v312_v29 = vsub.f32 %v308_v25, %v311_v28 }
 0x338   :  { %v313_v30 = vmul.f32 1.442695, %v312_v29 }
 0x33a   :  { %611 = vpow2.f32 %v313_v30 }
 0x33d   :  { %v323_v31 = vpop.permute.xlu0 %322 }
 0x33e   :  { %vm324_vm2 = vcmp.eq.s32.totalorder %v306_v23, %v323_v31 }
 0x33f   :  { %v325_v33 = vsel %vm324_vm2, %v308_v25, 0.0 }
 0x344   :  { %v612_v32 = vpop.eup %611 }
 0x345   :  { %315 = vadd.xlane.f32.xlu1 %v612_v32 }
 0x349   :  { %326 = vadd.xlane.f32.xlu1 %v325_v33 }
 0x3d2   :  { %v316_v34 = vpop.xlane.xlu1 %315 }
 0x3d3   :  { %613 = vlog2.f32 %v316_v34 }
 0x3d6   :  { %v327_v38 = vpop.xlane.xlu1 %326 }
 0x3dd   :  { %v614_v35 = vpop.eup %613 }
 0x3de   :  { %v318_v36 = vmul.f32 0.6931472, %v614_v35 }
 0x3e0   :  { %v319_v37 = vadd.f32 %v318_v36, %v311_v28 }
 0x3e2   :  { %v328_v39 = vsub.f32 %v319_v37, %v327_v38 }
 0x3e4   :  { %v330_v40 = vsel %vm329_vm3, %v328_v39, 0.0 }
 0x3e5   :  { %331 = vadd.xlane.f32.xlu1 %v330_v40 }
 0x3e6   :  { %626 = shalt.err (!%p623_p4)
}
 0x3e7   :  { %s627_s14 = scalar_lea.hbm %s916_s7, 128 }
 0x3e8   :  { %p628_p5 = scmp.ne.s32.totalorder %s916_s7, %s627_s14  ;;  %p631_p6 = scmp.lt.u32.totalorder %s627_s14, %s916_s7 }
 0x3ea   :  { %p633_p7 = pnand %p631_p6, %p628_p5 }
 0x3ec   :  { %636 = shalt.err (!%p633_p7)
}
 0x3ed   :  { %354 = dma.vmem_to_hbm [thread:$0]  %s352_s6, 128, %s916_s7, [#allocation3]  }
 0x3ee   :  { %s637_s24 = scalar_lea.hbm %s917_s8, 16 }
 0x3ef   :  { %p638_p8 = scmp.ne.s32.totalorder %s917_s8, %s637_s24  ;;  %p641_p9 = scmp.lt.u32.totalorder %s637_s24, %s917_s8 }
 0x3f1   :  { %p643_p10 = pnand %p641_p9, %p638_p8 }
 0x472   :  { %v332_v41 = vpop.xlane.xlu1 %331 }
 0x473   :  { %v333_v42 = vrot.slane %v332_v41, 4 }
 0x475   :  { %v334_v43 = vadd.f32 %v333_v42, %v332_v41 }
 0x477   :  { %v335_v44 = vrot.slane %v334_v43, 2 }
 0x479   :  { %v336_v45 = vadd.f32 %v335_v44, %v334_v43 }
 0x47b   :  { %v337_v46 = vrot.slane %v336_v45, 1 }
 0x47d   :  { %v338_v47 = vadd.f32 %v337_v46, %v336_v45 }
 0x47f   :  { %602 = vpush %v338_v47 }
 0x4b0   :  { %s603_s1 = spop %602 }
 0x4b1   :  { %s342_s21 = smul.f32 0.125, %s603_s1 }
 0x4b3   :  { %344 = sst [smem:[#allocation5]] %s342_s21 }
 0x4b4   :  { %646 = shalt.err (!%p643_p10)
}
 0x4b5   :  { %s656_s27 = smov [#allocation5]  }
 0x4b6   :  { %362 = dma.smem_to_hbm %s656_s27, 16, %s917_s8, [#allocation4]  }
 0x4b7   :  { %647 = dma.done.wait [#allocation3], 128  }
 0x4b8   :  { %648 = vsyncadd [#allocation3], 4294967168 }
 0x4b9   :  { %649 = dma.done.wait [#allocation4], 16  }
 0x4ba   :  { %650 = vsyncadd [#allocation4], 4294967280 }
 0x4bb   :  { %369 = sfence }
 0x4bc   :  { %370 = vsyncpa [#allocation3], 1 }
 0x4bd   :  { %371 = vsyncpa [#allocation4], 1 }

</bundles_post_ra>
